<compile_context>
chip_gen: v7x
topology: tpu7x:2x2x1
jax: 0.10.0
libtpu: 0.0.40
codegen_flags: <defaults>
</compile_context>

<pallas_src>
import math

import numpy as np
import jax
import jax.numpy as jnp
from jax import lax
from jax.experimental import pallas as pl
from jax.experimental.pallas import tpu as pltpu


CHUNK = 32          # unrolled FISTA steps between convergence checks
MAX_CHUNKS = 256    # iteration cap = CHUNK * MAX_CHUNKS = 8192
TOL = 1e-5          # max |lam change| over a chunk -> converged


def _make_qp_dual_kernel(beta):
    """Build the kernel with the momentum coefficient baked in as a constant."""
    beta = float(beta)
    one_plus_beta = 1.0 + beta

    def kernel(p_ref, Miter_ref, aGQinvT_ref, G_ref, Qinv_ref, z_ref):
        """Solve the batched QP dual with projected accelerated gradient.

        p_ref       : (B, nHidden)       primal linear term
        Miter_ref   : (nineq, nineq)     I - alpha * A,  A = G Q^{-1} G^T
        aGQinvT_ref : (nHidden, nineq)   alpha * (G Q^{-1})^T
        G_ref       : (nineq, nHidden)
        Qinv_ref    : (nHidden, nHidden)
        z_ref       : (B, nHidden)       full primal solution
        """
        p = p_ref[...]
        Miter = Miter_ref[...]
        # c = alpha * (G Q^{-1} p + h), h = 0; alpha pre-folded on the host.
        c = jnp.dot(p, aGQinvT_ref[...], preferred_element_type=jnp.float32)
        lam0 = jnp.zeros_like(c)

        def cond(carry):
            _, _, k, diff = carry
            return jnp.logical_and(diff > TOL, k < MAX_CHUNKS)

        def body(carry):
            lam, y, k, _ = carry
            lam_start = lam
            # CHUNK unrolled accelerated projected-gradient steps:
            #   lam' = max(y (I - alpha A) - alpha b, 0)
            #   y'   = (1+beta) lam' - beta lam
            for _ in range(CHUNK):
                lam_new = jnp.maximum(
                    jnp.dot(y, Miter, preferred_element_type=jnp.float32) - c,
                    0.0)
                y = one_plus_beta * lam_new - beta * lam
                lam = lam_new
            diff = jnp.max(jnp.abs(lam - lam_start))
            return lam, y, k + 1, diff

        lam, _, _, _ = lax.while_loop(
            cond, body,
            (lam0, lam0, jnp.int32(0), jnp.float32(1e30)))

        # Primal recovery: z = -Q^{-1} (p + G^T lam).
        z = -jnp.dot(p + jnp.dot(lam, G_ref[...],
                                 preferred_element_type=jnp.float32),
                     Qinv_ref[...], preferred_element_type=jnp.float32)
        z_ref[...] = z

    return kernel


class OptNetLearnDPallas:
    """JAX/Pallas equivalent of OptNet_LearnD (forward only)."""

    def __init__(self, nFeatures, eps=1e-2, key=None):
        if key is None:
            key = jax.random.PRNGKey(0)
        nHidden = 2 * nFeatures - 1
        nineq = 2 * nFeatures - 2
        self.nFeatures, self.nHidden, self.nineq, self.eps = (
            nFeatures, nHidden, nineq, eps)

        # Q_small = 1e-8*I with top-left nFeatures block = I  -> diagonal.
        # L = potrf(Q_small) is diagonal; the tril-ones mask M leaves it intact.
        # Q = L L^T + eps*I  -> diagonal.
        qdiag = np.concatenate([np.ones(nFeatures), 1e-8 * np.ones(nFeatures - 1)])
        Qdiag = qdiag + eps

        # Learnable D, deterministic init (matches 0.3 * randn shape-wise).
        self.D = 0.3 * jax.random.normal(key, (nFeatures - 1, nFeatures),
                                         dtype=jnp.float32)
        D_np = np.asarray(self.D, dtype=np.float64)
        nI = -np.eye(nFeatures - 1)
        G = np.concatenate([np.concatenate([D_np, nI], axis=1),
                            np.concatenate([-D_np, nI], axis=1)], axis=0)

        GQinv = G / Qdiag[None, :]            # G @ Q^{-1}
        A = GQinv @ G.T                       # dual Hessian (nineq, nineq)

        # Step size / momentum from the extreme eigenvalues of A.
        evals = np.linalg.eigvalsh(A)
        Lmax = float(evals[-1])
        mu = float(max(evals[0], 1e-12))
        kappa = Lmax / mu
        alpha = 1.0 / Lmax
        self.beta = (math.sqrt(kappa) - 1.0) / (math.sqrt(kappa) + 1.0)

        # Host-side precompute: fold alpha into the iteration matrix / linear term.
        self.Miter = jnp.asarray(np.eye(nineq) - alpha * A, dtype=jnp.float32)
        self.aGQinvT = jnp.asarray(alpha * GQinv.T, dtype=jnp.float32)
        self.G = jnp.asarray(G, dtype=jnp.float32)
        self.Qinv = jnp.asarray(np.diag(1.0 / Qdiag), dtype=jnp.float32)

        self._kernel = _make_qp_dual_kernel(self.beta)

    def __call__(self, x):
        x = x.astype(jnp.float32)
        B = x.shape[0]
        # p = cat((-x, 13 * ones(B, nFeatures-1)), dim=1)   (glue, cheap)
        p = jnp.concatenate(
            [-x, 13.0 * jnp.ones((B, self.nFeatures - 1), jnp.float32)], axis=1)

        vmem = pl.BlockSpec(memory_space=pltpu.MemorySpace.VMEM)
        z = pl.pallas_call(
            self._kernel,
            out_shape=jax.ShapeDtypeStruct((B, self.nHidden), jnp.float32),
            in_specs=[vmem, vmem, vmem, vmem, vmem],
            out_specs=vmem,
        )(p, self.Miter, self.aGQinvT, self.G, self.Qinv)
        return z[:, :self.nFeatures]

    def reference(self, x):
        """Pure-JAX reference (same math, no Pallas) for a correctness check."""
        x = x.astype(jnp.float32)
        B = x.shape[0]
        p = jnp.concatenate(
            [-x, 13.0 * jnp.ones((B, self.nFeatures - 1), jnp.float32)], axis=1)
        beta = float(self.beta)
        opb = 1.0 + beta
        c = p @ self.aGQinvT
        lam0 = jnp.zeros_like(c)

        def cond(carry):
            _, _, k, diff = carry
            return jnp.logical_and(diff > TOL, k < MAX_CHUNKS)

        def body(carry):
            lam, y, k, _ = carry
            lam_start = lam
            for _ in range(CHUNK):
                lam_new = jnp.maximum(y @ self.Miter - c, 0.0)
                y = opb * lam_new - beta * lam
                lam = lam_new
            return lam, y, k + 1, jnp.max(jnp.abs(lam - lam_start))

        lam, _, _, _ = lax.while_loop(
            cond, body, (lam0, lam0, jnp.int32(0), jnp.float32(1e30)))
        z = -(p + lam @ self.G) @ self.Qinv
        return z[:, :self.nFeatures]


if __name__ == "__main__":
    nFeatures = 8
    batch = 4

    key = jax.random.PRNGKey(0)
    k_param, k_x = jax.random.split(key)

    model = OptNetLearnDPallas(nFeatures, eps=1e-2, key=k_param)
    x = jax.random.normal(k_x, (batch, nFeatures), dtype=jnp.float32)

    out = model(x)
    out = jax.block_until_ready(out)

    ref = jax.block_until_ready(model.reference(x))
    assert out.shape == (batch, nFeatures)
    assert np.all(np.isfinite(np.asarray(out)))
    assert np.allclose(np.asarray(out), np.asarray(ref), atol=1e-3, rtol=1e-3)

    print("KERNEL_OK")
</pallas_src>

<mosaic_0001>
module attributes {stable_mosaic.version = 11 : i64} {
  func.func @kernel(%arg0: memref<4x15xf32, #tpu.memory_space<vmem>>, %arg1: memref<14x14xf32, #tpu.memory_space<vmem>>, %arg2: memref<15x14xf32, #tpu.memory_space<vmem>>, %arg3: memref<14x15xf32, #tpu.memory_space<vmem>>, %arg4: memref<15x15xf32, #tpu.memory_space<vmem>>, %arg5: memref<4x15xf32, #tpu.memory_space<vmem>>) attributes {dimension_semantics = [], scalar_prefetch = 0 : i64, scratch_operands = 0 : i64, tpu.core_type = #tpu.core_type<tc>} {
    %c0 = arith.constant 0 : index
    %c0_0 = arith.constant 0 : index
    %0 = vector.load %arg0[%c0, %c0_0] : memref<4x15xf32, #tpu.memory_space<vmem>>, vector<4x15xf32>
    %c0_1 = arith.constant 0 : index
    %c0_2 = arith.constant 0 : index
    %1 = vector.load %arg1[%c0_1, %c0_2] : memref<14x14xf32, #tpu.memory_space<vmem>>, vector<14x14xf32>
    %c0_3 = arith.constant 0 : index
    %c0_4 = arith.constant 0 : index
    %2 = vector.load %arg2[%c0_3, %c0_4] : memref<15x14xf32, #tpu.memory_space<vmem>>, vector<15x14xf32>
    %cst = arith.constant dense<0.000000e+00> : vector<4x14xf32>
    %3 = tpu.matmul %0, %2, %cst {dimension_numbers = #tpu.dot_dimension_numbers<[1], [0], [0], [1], [0, 0, 1, 1], [], []>} : vector<4x15xf32>, vector<15x14xf32>, vector<4x14xf32> -> vector<4x14xf32>
    %cst_5 = arith.constant 0.000000e+00 : f32
    %4 = vector.broadcast %cst_5 : f32 to vector<4x14xf32>
    %c0_i32 = arith.constant 0 : i32
    %cst_6 = arith.constant 1.000000e+30 : f32
    %5:4 = scf.while (%arg6 = %4, %arg7 = %4, %arg8 = %c0_i32, %arg9 = %cst_6) : (vector<4x14xf32>, vector<4x14xf32>, i32, f32) -> (vector<4x14xf32>, vector<4x14xf32>, i32, f32) {
      %cst_16 = arith.constant 9.99999974E-6 : f32
      %14 = arith.cmpf ogt, %arg9, %cst_16 : f32
      %c256_i32 = arith.constant 256 : i32
      %15 = arith.cmpi slt, %arg8, %c256_i32 : i32
      %16 = arith.andi %14, %15 : i1
      scf.condition(%16) %arg6, %arg7, %arg8, %arg9 : vector<4x14xf32>, vector<4x14xf32>, i32, f32
    } do {
    ^bb0(%arg6: vector<4x14xf32>, %arg7: vector<4x14xf32>, %arg8: i32, %arg9: f32):
      %cst_16 = arith.constant dense<0.000000e+00> : vector<4x14xf32>
      %14 = tpu.matmul %arg7, %1, %cst_16 {dimension_numbers = #tpu.dot_dimension_numbers<[1], [0], [0], [1], [0, 0, 1, 1], [], []>} : vector<4x14xf32>, vector<14x14xf32>, vector<4x14xf32> -> vector<4x14xf32>
      %15 = arith.subf %14, %3 : vector<4x14xf32>
      %cst_17 = arith.constant 0.000000e+00 : f32
      %16 = vector.broadcast %cst_17 : f32 to vector<4x14xf32>
      %17 = arith.maximumf %15, %16 : vector<4x14xf32>
      %cst_18 = arith.constant 1.9773587 : f32
      %18 = vector.broadcast %cst_18 : f32 to vector<4x14xf32>
      %19 = arith.mulf %18, %17 : vector<4x14xf32>
      %cst_19 = arith.constant 0.977358698 : f32
      %20 = vector.broadcast %cst_19 : f32 to vector<4x14xf32>
      %21 = arith.mulf %20, %arg6 : vector<4x14xf32>
      %22 = arith.subf %19, %21 : vector<4x14xf32>
      %cst_20 = arith.constant dense<0.000000e+00> : vector<4x14xf32>
      %23 = tpu.matmul %22, %1, %cst_20 {dimension_numbers = #tpu.dot_dimension_numbers<[1], [0], [0], [1], [0, 0, 1, 1], [], []>} : vector<4x14xf32>, vector<14x14xf32>, vector<4x14xf32> -> vector<4x14xf32>
      %24 = arith.subf %23, %3 : vector<4x14xf32>
      %cst_21 = arith.constant 0.000000e+00 : f32
      %25 = vector.broadcast %cst_21 : f32 to vector<4x14xf32>
      %26 = arith.maximumf %24, %25 : vector<4x14xf32>
      %cst_22 = arith.constant 1.9773587 : f32
      %27 = vector.broadcast %cst_22 : f32 to vector<4x14xf32>
      %28 = arith.mulf %27, %26 : vector<4x14xf32>
      %cst_23 = arith.constant 0.977358698 : f32
      %29 = vector.broadcast %cst_23 : f32 to vector<4x14xf32>
      %30 = arith.mulf %29, %17 : vector<4x14xf32>
      %31 = arith.subf %28, %30 : vector<4x14xf32>
      %cst_24 = arith.constant dense<0.000000e+00> : vector<4x14xf32>
      %32 = tpu.matmul %31, %1, %cst_24 {dimension_numbers = #tpu.dot_dimension_numbers<[1], [0], [0], [1], [0, 0, 1, 1], [], []>} : vector<4x14xf32>, vector<14x14xf32>, vector<4x14xf32> -> vector<4x14xf32>
      %33 = arith.subf %32, %3 : vector<4x14xf32>
      %cst_25 = arith.constant 0.000000e+00 : f32
      %34 = vector.broadcast %cst_25 : f32 to vector<4x14xf32>
      %35 = arith.maximumf %33, %34 : vector<4x14xf32>
      %cst_26 = arith.constant 1.9773587 : f32
      %36 = vector.broadcast %cst_26 : f32 to vector<4x14xf32>
      %37 = arith.mulf %36, %35 : vector<4x14xf32>
      %cst_27 = arith.constant 0.977358698 : f32
      %38 = vector.broadcast %cst_27 : f32 to vector<4x14xf32>
      %39 = arith.mulf %38, %26 : vector<4x14xf32>
      %40 = arith.subf %37, %39 : vector<4x14xf32>
      %cst_28 = arith.constant dense<0.000000e+00> : vector<4x14xf32>
      %41 = tpu.matmul %40, %1, %cst_28 {dimension_numbers = #tpu.dot_dimension_numbers<[1], [0], [0], [1], [0, 0, 1, 1], [], []>} : vector<4x14xf32>, vector<14x14xf32>, vector<4x14xf32> -> vector<4x14xf32>
      %42 = arith.subf %41, %3 : vector<4x14xf32>
      %cst_29 = arith.constant 0.000000e+00 : f32
      %43 = vector.broadcast %cst_29 : f32 to vector<4x14xf32>
      %44 = arith.maximumf %42, %43 : vector<4x14xf32>
      %cst_30 = arith.constant 1.9773587 : f32
      %45 = vector.broadcast %cst_30 : f32 to vector<4x14xf32>
      %46 = arith.mulf %45, %44 : vector<4x14xf32>
      %cst_31 = arith.constant 0.977358698 : f32
      %47 = vector.broadcast %cst_31 : f32 to vector<4x14xf32>
      %48 = arith.mulf %47, %35 : vector<4x14xf32>
      %49 = arith.subf %46, %48 : vector<4x14xf32>
      %cst_32 = arith.constant dense<0.000000e+00> : vector<4x14xf32>
      %50 = tpu.matmul %49, %1, %cst_32 {dimension_numbers = #tpu.dot_dimension_numbers<[1], [0], [0], [1], [0, 0, 1, 1], [], []>} : vector<4x14xf32>, vector<14x14xf32>, vector<4x14xf32> -> vector<4x14xf32>
      %51 = arith.subf %50, %3 : vector<4x14xf32>
      %cst_33 = arith.constant 0.000000e+00 : f32
      %52 = vector.broadcast %cst_33 : f32 to vector<4x14xf32>
      %53 = arith.maximumf %51, %52 : vector<4x14xf32>
      %cst_34 = arith.constant 1.9773587 : f32
      %54 = vector.broadcast %cst_34 : f32 to vector<4x14xf32>
      %55 = arith.mulf %54, %53 : vector<4x14xf32>
      %cst_35 = arith.constant 0.977358698 : f32
      %56 = vector.broadcast %cst_35 : f32 to vector<4x14xf32>
      %57 = arith.mulf %56, %44 : vector<4x14xf32>
      %58 = arith.subf %55, %57 : vector<4x14xf32>
      %cst_36 = arith.constant dense<0.000000e+00> : vector<4x14xf32>
      %59 = tpu.matmul %58, %1, %cst_36 {dimension_numbers = #tpu.dot_dimension_numbers<[1], [0], [0], [1], [0, 0, 1, 1], [], []>} : vector<4x14xf32>, vector<14x14xf32>, vector<4x14xf32> -> vector<4x14xf32>
      %60 = arith.subf %59, %3 : vector<4x14xf32>
      %cst_37 = arith.constant 0.000000e+00 : f32
      %61 = vector.broadcast %cst_37 : f32 to vector<4x14xf32>
      %62 = arith.maximumf %60, %61 : vector<4x14xf32>
      %cst_38 = arith.constant 1.9773587 : f32
      %63 = vector.broadcast %cst_38 : f32 to vector<4x14xf32>
      %64 = arith.mulf %63, %62 : vector<4x14xf32>
      %cst_39 = arith.constant 0.977358698 : f32
      %65 = vector.broadcast %cst_39 : f32 to vector<4x14xf32>
      %66 = arith.mulf %65, %53 : vector<4x14xf32>
      %67 = arith.subf %64, %66 : vector<4x14xf32>
      %cst_40 = arith.constant dense<0.000000e+00> : vector<4x14xf32>
      %68 = tpu.matmul %67, %1, %cst_40 {dimension_numbers = #tpu.dot_dimension_numbers<[1], [0], [0], [1], [0, 0, 1, 1], [], []>} : vector<4x14xf32>, vector<14x14xf32>, vector<4x14xf32> -> vector<4x14xf32>
      %69 = arith.subf %68, %3 : vector<4x14xf32>
      %cst_41 = arith.constant 0.000000e+00 : f32
      %70 = vector.broadcast %cst_41 : f32 to vector<4x14xf32>
      %71 = arith.maximumf %69, %70 : vector<4x14xf32>
      %cst_42 = arith.constant 1.9773587 : f32
      %72 = vector.broadcast %cst_42 : f32 to vector<4x14xf32>
      %73 = arith.mulf %72, %71 : vector<4x14xf32>
      %cst_43 = arith.constant 0.977358698 : f32
      %74 = vector.broadcast %cst_43 : f32 to vector<4x14xf32>
      %75 = arith.mulf %74, %62 : vector<4x14xf32>
      %76 = arith.subf %73, %75 : vector<4x14xf32>
      %cst_44 = arith.constant dense<0.000000e+00> : vector<4x14xf32>
      %77 = tpu.matmul %76, %1, %cst_44 {dimension_numbers = #tpu.dot_dimension_numbers<[1], [0], [0], [1], [0, 0, 1, 1], [], []>} : vector<4x14xf32>, vector<14x14xf32>, vector<4x14xf32> -> vector<4x14xf32>
      %78 = arith.subf %77, %3 : vector<4x14xf32>
      %cst_45 = arith.constant 0.000000e+00 : f32
      %79 = vector.broadcast %cst_45 : f32 to vector<4x14xf32>
      %80 = arith.maximumf %78, %79 : vector<4x14xf32>
      %cst_46 = arith.constant 1.9773587 : f32
      %81 = vector.broadcast %cst_46 : f32 to vector<4x14xf32>
      %82 = arith.mulf %81, %80 : vector<4x14xf32>
      %cst_47 = arith.constant 0.977358698 : f32
      %83 = vector.broadcast %cst_47 : f32 to vector<4x14xf32>
      %84 = arith.mulf %83, %71 : vector<4x14xf32>
      %85 = arith.subf %82, %84 : vector<4x14xf32>
      %cst_48 = arith.constant dense<0.000000e+00> : vector<4x14xf32>
      %86 = tpu.matmul %85, %1, %cst_48 {dimension_numbers = #tpu.dot_dimension_numbers<[1], [0], [0], [1], [0, 0, 1, 1], [], []>} : vector<4x14xf32>, vector<14x14xf32>, vector<4x14xf32> -> vector<4x14xf32>
      %87 = arith.subf %86, %3 : vector<4x14xf32>
      %cst_49 = arith.constant 0.000000e+00 : f32
      %88 = vector.broadcast %cst_49 : f32 to vector<4x14xf32>
      %89 = arith.maximumf %87, %88 : vector<4x14xf32>
      %cst_50 = arith.constant 1.9773587 : f32
      %90 = vector.broadcast %cst_50 : f32 to vector<4x14xf32>
      %91 = arith.mulf %90, %89 : vector<4x14xf32>
      %cst_51 = arith.constant 0.977358698 : f32
      %92 = vector.broadcast %cst_51 : f32 to vector<4x14xf32>
      %93 = arith.mulf %92, %80 : vector<4x14xf32>
      %94 = arith.subf %91, %93 : vector<4x14xf32>
      %cst_52 = arith.constant dense<0.000000e+00> : vector<4x14xf32>
      %95 = tpu.matmul %94, %1, %cst_52 {dimension_numbers = #tpu.dot_dimension_numbers<[1], [0], [0], [1], [0, 0, 1, 1], [], []>} : vector<4x14xf32>, vector<14x14xf32>, vector<4x14xf32> -> vector<4x14xf32>
      %96 = arith.subf %95, %3 : vector<4x14xf32>
      %cst_53 = arith.constant 0.000000e+00 : f32
      %97 = vector.broadcast %cst_53 : f32 to vector<4x14xf32>
      %98 = arith.maximumf %96, %97 : vector<4x14xf32>
      %cst_54 = arith.constant 1.9773587 : f32
      %99 = vector.broadcast %cst_54 : f32 to vector<4x14xf32>
      %100 = arith.mulf %99, %98 : vector<4x14xf32>
      %cst_55 = arith.constant 0.977358698 : f32
      %101 = vector.broadcast %cst_55 : f32 to vector<4x14xf32>
      %102 = arith.mulf %101, %89 : vector<4x14xf32>
      %103 = arith.subf %100, %102 : vector<4x14xf32>
      %cst_56 = arith.constant dense<0.000000e+00> : vector<4x14xf32>
      %104 = tpu.matmul %103, %1, %cst_56 {dimension_numbers = #tpu.dot_dimension_numbers<[1], [0], [0], [1], [0, 0, 1, 1], [], []>} : vector<4x14xf32>, vector<14x14xf32>, vector<4x14xf32> -> vector<4x14xf32>
      %105 = arith.subf %104, %3 : vector<4x14xf32>
      %cst_57 = arith.constant 0.000000e+00 : f32
      %106 = vector.broadcast %cst_57 : f32 to vector<4x14xf32>
      %107 = arith.maximumf %105, %106 : vector<4x14xf32>
      %cst_58 = arith.constant 1.9773587 : f32
      %108 = vector.broadcast %cst_58 : f32 to vector<4x14xf32>
      %109 = arith.mulf %108, %107 : vector<4x14xf32>
      %cst_59 = arith.constant 0.977358698 : f32
      %110 = vector.broadcast %cst_59 : f32 to vector<4x14xf32>
      %111 = arith.mulf %110, %98 : vector<4x14xf32>
      %112 = arith.subf %109, %111 : vector<4x14xf32>
      %cst_60 = arith.constant dense<0.000000e+00> : vector<4x14xf32>
      %113 = tpu.matmul %112, %1, %cst_60 {dimension_numbers = #tpu.dot_dimension_numbers<[1], [0], [0], [1], [0, 0, 1, 1], [], []>} : vector<4x14xf32>, vector<14x14xf32>, vector<4x14xf32> -> vector<4x14xf32>
      %114 = arith.subf %113, %3 : vector<4x14xf32>
      %cst_61 = arith.constant 0.000000e+00 : f32
      %115 = vector.broadcast %cst_61 : f32 to vector<4x14xf32>
      %116 = arith.maximumf %114, %115 : vector<4x14xf32>
      %cst_62 = arith.constant 1.9773587 : f32
      %117 = vector.broadcast %cst_62 : f32 to vector<4x14xf32>
      %118 = arith.mulf %117, %116 : vector<4x14xf32>
      %cst_63 = arith.constant 0.977358698 : f32
      %119 = vector.broadcast %cst_63 : f32 to vector<4x14xf32>
      %120 = arith.mulf %119, %107 : vector<4x14xf32>
      %121 = arith.subf %118, %120 : vector<4x14xf32>
      %cst_64 = arith.constant dense<0.000000e+00> : vector<4x14xf32>
      %122 = tpu.matmul %121, %1, %cst_64 {dimension_numbers = #tpu.dot_dimension_numbers<[1], [0], [0], [1], [0, 0, 1, 1], [], []>} : vector<4x14xf32>, vector<14x14xf32>, vector<4x14xf32> -> vector<4x14xf32>
      %123 = arith.subf %122, %3 : vector<4x14xf32>
      %cst_65 = arith.constant 0.000000e+00 : f32
      %124 = vector.broadcast %cst_65 : f32 to vector<4x14xf32>
      %125 = arith.maximumf %123, %124 : vector<4x14xf32>
      %cst_66 = arith.constant 1.9773587 : f32
      %126 = vector.broadcast %cst_66 : f32 to vector<4x14xf32>
      %127 = arith.mulf %126, %125 : vector<4x14xf32>
      %cst_67 = arith.constant 0.977358698 : f32
      %128 = vector.broadcast %cst_67 : f32 to vector<4x14xf32>
      %129 = arith.mulf %128, %116 : vector<4x14xf32>
      %130 = arith.subf %127, %129 : vector<4x14xf32>
      %cst_68 = arith.constant dense<0.000000e+00> : vector<4x14xf32>
      %131 = tpu.matmul %130, %1, %cst_68 {dimension_numbers = #tpu.dot_dimension_numbers<[1], [0], [0], [1], [0, 0, 1, 1], [], []>} : vector<4x14xf32>, vector<14x14xf32>, vector<4x14xf32> -> vector<4x14xf32>
      %132 = arith.subf %131, %3 : vector<4x14xf32>
      %cst_69 = arith.constant 0.000000e+00 : f32
      %133 = vector.broadcast %cst_69 : f32 to vector<4x14xf32>
      %134 = arith.maximumf %132, %133 : vector<4x14xf32>
      %cst_70 = arith.constant 1.9773587 : f32
      %135 = vector.broadcast %cst_70 : f32 to vector<4x14xf32>
      %136 = arith.mulf %135, %134 : vector<4x14xf32>
      %cst_71 = arith.constant 0.977358698 : f32
      %137 = vector.broadcast %cst_71 : f32 to vector<4x14xf32>
      %138 = arith.mulf %137, %125 : vector<4x14xf32>
      %139 = arith.subf %136, %138 : vector<4x14xf32>
      %cst_72 = arith.constant dense<0.000000e+00> : vector<4x14xf32>
      %140 = tpu.matmul %139, %1, %cst_72 {dimension_numbers = #tpu.dot_dimension_numbers<[1], [0], [0], [1], [0, 0, 1, 1], [], []>} : vector<4x14xf32>, vector<14x14xf32>, vector<4x14xf32> -> vector<4x14xf32>
      %141 = arith.subf %140, %3 : vector<4x14xf32>
      %cst_73 = arith.constant 0.000000e+00 : f32
      %142 = vector.broadcast %cst_73 : f32 to vector<4x14xf32>
      %143 = arith.maximumf %141, %142 : vector<4x14xf32>
      %cst_74 = arith.constant 1.9773587 : f32
      %144 = vector.broadcast %cst_74 : f32 to vector<4x14xf32>
      %145 = arith.mulf %144, %143 : vector<4x14xf32>
      %cst_75 = arith.constant 0.977358698 : f32
      %146 = vector.broadcast %cst_75 : f32 to vector<4x14xf32>
      %147 = arith.mulf %146, %134 : vector<4x14xf32>
      %148 = arith.subf %145, %147 : vector<4x14xf32>
      %cst_76 = arith.constant dense<0.000000e+00> : vector<4x14xf32>
      %149 = tpu.matmul %148, %1, %cst_76 {dimension_numbers = #tpu.dot_dimension_numbers<[1], [0], [0], [1], [0, 0, 1, 1], [], []>} : vector<4x14xf32>, vector<14x14xf32>, vector<4x14xf32> -> vector<4x14xf32>
      %150 = arith.subf %149, %3 : vector<4x14xf32>
      %cst_77 = arith.constant 0.000000e+00 : f32
      %151 = vector.broadcast %cst_77 : f32 to vector<4x14xf32>
      %152 = arith.maximumf %150, %151 : vector<4x14xf32>
      %cst_78 = arith.constant 1.9773587 : f32
      %153 = vector.broadcast %cst_78 : f32 to vector<4x14xf32>
      %154 = arith.mulf %153, %152 : vector<4x14xf32>
      %cst_79 = arith.constant 0.977358698 : f32
      %155 = vector.broadcast %cst_79 : f32 to vector<4x14xf32>
      %156 = arith.mulf %155, %143 : vector<4x14xf32>
      %157 = arith.subf %154, %156 : vector<4x14xf32>
      %cst_80 = arith.constant dense<0.000000e+00> : vector<4x14xf32>
      %158 = tpu.matmul %157, %1, %cst_80 {dimension_numbers = #tpu.dot_dimension_numbers<[1], [0], [0], [1], [0, 0, 1, 1], [], []>} : vector<4x14xf32>, vector<14x14xf32>, vector<4x14xf32> -> vector<4x14xf32>
      %159 = arith.subf %158, %3 : vector<4x14xf32>
      %cst_81 = arith.constant 0.000000e+00 : f32
      %160 = vector.broadcast %cst_81 : f32 to vector<4x14xf32>
      %161 = arith.maximumf %159, %160 : vector<4x14xf32>
      %cst_82 = arith.constant 1.9773587 : f32
      %162 = vector.broadcast %cst_82 : f32 to vector<4x14xf32>
      %163 = arith.mulf %162, %161 : vector<4x14xf32>
      %cst_83 = arith.constant 0.977358698 : f32
      %164 = vector.broadcast %cst_83 : f32 to vector<4x14xf32>
      %165 = arith.mulf %164, %152 : vector<4x14xf32>
      %166 = arith.subf %163, %165 : vector<4x14xf32>
      %cst_84 = arith.constant dense<0.000000e+00> : vector<4x14xf32>
      %167 = tpu.matmul %166, %1, %cst_84 {dimension_numbers = #tpu.dot_dimension_numbers<[1], [0], [0], [1], [0, 0, 1, 1], [], []>} : vector<4x14xf32>, vector<14x14xf32>, vector<4x14xf32> -> vector<4x14xf32>
      %168 = arith.subf %167, %3 : vector<4x14xf32>
      %cst_85 = arith.constant 0.000000e+00 : f32
      %169 = vector.broadcast %cst_85 : f32 to vector<4x14xf32>
      %170 = arith.maximumf %168, %169 : vector<4x14xf32>
      %cst_86 = arith.constant 1.9773587 : f32
      %171 = vector.broadcast %cst_86 : f32 to vector<4x14xf32>
      %172 = arith.mulf %171, %170 : vector<4x14xf32>
      %cst_87 = arith.constant 0.977358698 : f32
      %173 = vector.broadcast %cst_87 : f32 to vector<4x14xf32>
      %174 = arith.mulf %173, %161 : vector<4x14xf32>
      %175 = arith.subf %172, %174 : vector<4x14xf32>
      %cst_88 = arith.constant dense<0.000000e+00> : vector<4x14xf32>
      %176 = tpu.matmul %175, %1, %cst_88 {dimension_numbers = #tpu.dot_dimension_numbers<[1], [0], [0], [1], [0, 0, 1, 1], [], []>} : vector<4x14xf32>, vector<14x14xf32>, vector<4x14xf32> -> vector<4x14xf32>
      %177 = arith.subf %176, %3 : vector<4x14xf32>
      %cst_89 = arith.constant 0.000000e+00 : f32
      %178 = vector.broadcast %cst_89 : f32 to vector<4x14xf32>
      %179 = arith.maximumf %177, %178 : vector<4x14xf32>
      %cst_90 = arith.constant 1.9773587 : f32
      %180 = vector.broadcast %cst_90 : f32 to vector<4x14xf32>
      %181 = arith.mulf %180, %179 : vector<4x14xf32>
      %cst_91 = arith.constant 0.977358698 : f32
      %182 = vector.broadcast %cst_91 : f32 to vector<4x14xf32>
      %183 = arith.mulf %182, %170 : vector<4x14xf32>
      %184 = arith.subf %181, %183 : vector<4x14xf32>
      %cst_92 = arith.constant dense<0.000000e+00> : vector<4x14xf32>
      %185 = tpu.matmul %184, %1, %cst_92 {dimension_numbers = #tpu.dot_dimension_numbers<[1], [0], [0], [1], [0, 0, 1, 1], [], []>} : vector<4x14xf32>, vector<14x14xf32>, vector<4x14xf32> -> vector<4x14xf32>
      %186 = arith.subf %185, %3 : vector<4x14xf32>
      %cst_93 = arith.constant 0.000000e+00 : f32
      %187 = vector.broadcast %cst_93 : f32 to vector<4x14xf32>
      %188 = arith.maximumf %186, %187 : vector<4x14xf32>
      %cst_94 = arith.constant 1.9773587 : f32
      %189 = vector.broadcast %cst_94 : f32 to vector<4x14xf32>
      %190 = arith.mulf %189, %188 : vector<4x14xf32>
      %cst_95 = arith.constant 0.977358698 : f32
      %191 = vector.broadcast %cst_95 : f32 to vector<4x14xf32>
      %192 = arith.mulf %191, %179 : vector<4x14xf32>
      %193 = arith.subf %190, %192 : vector<4x14xf32>
      %cst_96 = arith.constant dense<0.000000e+00> : vector<4x14xf32>
      %194 = tpu.matmul %193, %1, %cst_96 {dimension_numbers = #tpu.dot_dimension_numbers<[1], [0], [0], [1], [0, 0, 1, 1], [], []>} : vector<4x14xf32>, vector<14x14xf32>, vector<4x14xf32> -> vector<4x14xf32>
      %195 = arith.subf %194, %3 : vector<4x14xf32>
      %cst_97 = arith.constant 0.000000e+00 : f32
      %196 = vector.broadcast %cst_97 : f32 to vector<4x14xf32>
      %197 = arith.maximumf %195, %196 : vector<4x14xf32>
      %cst_98 = arith.constant 1.9773587 : f32
      %198 = vector.broadcast %cst_98 : f32 to vector<4x14xf32>
      %199 = arith.mulf %198, %197 : vector<4x14xf32>
      %cst_99 = arith.constant 0.977358698 : f32
      %200 = vector.broadcast %cst_99 : f32 to vector<4x14xf32>
      %201 = arith.mulf %200, %188 : vector<4x14xf32>
      %202 = arith.subf %199, %201 : vector<4x14xf32>
      %cst_100 = arith.constant dense<0.000000e+00> : vector<4x14xf32>
      %203 = tpu.matmul %202, %1, %cst_100 {dimension_numbers = #tpu.dot_dimension_numbers<[1], [0], [0], [1], [0, 0, 1, 1], [], []>} : vector<4x14xf32>, vector<14x14xf32>, vector<4x14xf32> -> vector<4x14xf32>
      %204 = arith.subf %203, %3 : vector<4x14xf32>
      %cst_101 = arith.constant 0.000000e+00 : f32
      %205 = vector.broadcast %cst_101 : f32 to vector<4x14xf32>
      %206 = arith.maximumf %204, %205 : vector<4x14xf32>
      %cst_102 = arith.constant 1.9773587 : f32
      %207 = vector.broadcast %cst_102 : f32 to vector<4x14xf32>
      %208 = arith.mulf %207, %206 : vector<4x14xf32>
      %cst_103 = arith.constant 0.977358698 : f32
      %209 = vector.broadcast %cst_103 : f32 to vector<4x14xf32>
      %210 = arith.mulf %209, %197 : vector<4x14xf32>
      %211 = arith.subf %208, %210 : vector<4x14xf32>
      %cst_104 = arith.constant dense<0.000000e+00> : vector<4x14xf32>
      %212 = tpu.matmul %211, %1, %cst_104 {dimension_numbers = #tpu.dot_dimension_numbers<[1], [0], [0], [1], [0, 0, 1, 1], [], []>} : vector<4x14xf32>, vector<14x14xf32>, vector<4x14xf32> -> vector<4x14xf32>
      %213 = arith.subf %212, %3 : vector<4x14xf32>
      %cst_105 = arith.constant 0.000000e+00 : f32
      %214 = vector.broadcast %cst_105 : f32 to vector<4x14xf32>
      %215 = arith.maximumf %213, %214 : vector<4x14xf32>
      %cst_106 = arith.constant 1.9773587 : f32
      %216 = vector.broadcast %cst_106 : f32 to vector<4x14xf32>
      %217 = arith.mulf %216, %215 : vector<4x14xf32>
      %cst_107 = arith.constant 0.977358698 : f32
      %218 = vector.broadcast %cst_107 : f32 to vector<4x14xf32>
      %219 = arith.mulf %218, %206 : vector<4x14xf32>
      %220 = arith.subf %217, %219 : vector<4x14xf32>
      %cst_108 = arith.constant dense<0.000000e+00> : vector<4x14xf32>
      %221 = tpu.matmul %220, %1, %cst_108 {dimension_numbers = #tpu.dot_dimension_numbers<[1], [0], [0], [1], [0, 0, 1, 1], [], []>} : vector<4x14xf32>, vector<14x14xf32>, vector<4x14xf32> -> vector<4x14xf32>
      %222 = arith.subf %221, %3 : vector<4x14xf32>
      %cst_109 = arith.constant 0.000000e+00 : f32
      %223 = vector.broadcast %cst_109 : f32 to vector<4x14xf32>
      %224 = arith.maximumf %222, %223 : vector<4x14xf32>
      %cst_110 = arith.constant 1.9773587 : f32
      %225 = vector.broadcast %cst_110 : f32 to vector<4x14xf32>
      %226 = arith.mulf %225, %224 : vector<4x14xf32>
      %cst_111 = arith.constant 0.977358698 : f32
      %227 = vector.broadcast %cst_111 : f32 to vector<4x14xf32>
      %228 = arith.mulf %227, %215 : vector<4x14xf32>
      %229 = arith.subf %226, %228 : vector<4x14xf32>
      %cst_112 = arith.constant dense<0.000000e+00> : vector<4x14xf32>
      %230 = tpu.matmul %229, %1, %cst_112 {dimension_numbers = #tpu.dot_dimension_numbers<[1], [0], [0], [1], [0, 0, 1, 1], [], []>} : vector<4x14xf32>, vector<14x14xf32>, vector<4x14xf32> -> vector<4x14xf32>
      %231 = arith.subf %230, %3 : vector<4x14xf32>
      %cst_113 = arith.constant 0.000000e+00 : f32
      %232 = vector.broadcast %cst_113 : f32 to vector<4x14xf32>
      %233 = arith.maximumf %231, %232 : vector<4x14xf32>
      %cst_114 = arith.constant 1.9773587 : f32
      %234 = vector.broadcast %cst_114 : f32 to vector<4x14xf32>
      %235 = arith.mulf %234, %233 : vector<4x14xf32>
      %cst_115 = arith.constant 0.977358698 : f32
      %236 = vector.broadcast %cst_115 : f32 to vector<4x14xf32>
      %237 = arith.mulf %236, %224 : vector<4x14xf32>
      %238 = arith.subf %235, %237 : vector<4x14xf32>
      %cst_116 = arith.constant dense<0.000000e+00> : vector<4x14xf32>
      %239 = tpu.matmul %238, %1, %cst_116 {dimension_numbers = #tpu.dot_dimension_numbers<[1], [0], [0], [1], [0, 0, 1, 1], [], []>} : vector<4x14xf32>, vector<14x14xf32>, vector<4x14xf32> -> vector<4x14xf32>
      %240 = arith.subf %239, %3 : vector<4x14xf32>
      %cst_117 = arith.constant 0.000000e+00 : f32
      %241 = vector.broadcast %cst_117 : f32 to vector<4x14xf32>
      %242 = arith.maximumf %240, %241 : vector<4x14xf32>
      %cst_118 = arith.constant 1.9773587 : f32
      %243 = vector.broadcast %cst_118 : f32 to vector<4x14xf32>
      %244 = arith.mulf %243, %242 : vector<4x14xf32>
      %cst_119 = arith.constant 0.977358698 : f32
      %245 = vector.broadcast %cst_119 : f32 to vector<4x14xf32>
      %246 = arith.mulf %245, %233 : vector<4x14xf32>
      %247 = arith.subf %244, %246 : vector<4x14xf32>
      %cst_120 = arith.constant dense<0.000000e+00> : vector<4x14xf32>
      %248 = tpu.matmul %247, %1, %cst_120 {dimension_numbers = #tpu.dot_dimension_numbers<[1], [0], [0], [1], [0, 0, 1, 1], [], []>} : vector<4x14xf32>, vector<14x14xf32>, vector<4x14xf32> -> vector<4x14xf32>
      %249 = arith.subf %248, %3 : vector<4x14xf32>
      %cst_121 = arith.constant 0.000000e+00 : f32
      %250 = vector.broadcast %cst_121 : f32 to vector<4x14xf32>
      %251 = arith.maximumf %249, %250 : vector<4x14xf32>
      %cst_122 = arith.constant 1.9773587 : f32
      %252 = vector.broadcast %cst_122 : f32 to vector<4x14xf32>
      %253 = arith.mulf %252, %251 : vector<4x14xf32>
      %cst_123 = arith.constant 0.977358698 : f32
      %254 = vector.broadcast %cst_123 : f32 to vector<4x14xf32>
      %255 = arith.mulf %254, %242 : vector<4x14xf32>
      %256 = arith.subf %253, %255 : vector<4x14xf32>
      %cst_124 = arith.constant dense<0.000000e+00> : vector<4x14xf32>
      %257 = tpu.matmul %256, %1, %cst_124 {dimension_numbers = #tpu.dot_dimension_numbers<[1], [0], [0], [1], [0, 0, 1, 1], [], []>} : vector<4x14xf32>, vector<14x14xf32>, vector<4x14xf32> -> vector<4x14xf32>
      %258 = arith.subf %257, %3 : vector<4x14xf32>
      %cst_125 = arith.constant 0.000000e+00 : f32
      %259 = vector.broadcast %cst_125 : f32 to vector<4x14xf32>
      %260 = arith.maximumf %258, %259 : vector<4x14xf32>
      %cst_126 = arith.constant 1.9773587 : f32
      %261 = vector.broadcast %cst_126 : f32 to vector<4x14xf32>
      %262 = arith.mulf %261, %260 : vector<4x14xf32>
      %cst_127 = arith.constant 0.977358698 : f32
      %263 = vector.broadcast %cst_127 : f32 to vector<4x14xf32>
      %264 = arith.mulf %263, %251 : vector<4x14xf32>
      %265 = arith.subf %262, %264 : vector<4x14xf32>
      %cst_128 = arith.constant dense<0.000000e+00> : vector<4x14xf32>
      %266 = tpu.matmul %265, %1, %cst_128 {dimension_numbers = #tpu.dot_dimension_numbers<[1], [0], [0], [1], [0, 0, 1, 1], [], []>} : vector<4x14xf32>, vector<14x14xf32>, vector<4x14xf32> -> vector<4x14xf32>
      %267 = arith.subf %266, %3 : vector<4x14xf32>
      %cst_129 = arith.constant 0.000000e+00 : f32
      %268 = vector.broadcast %cst_129 : f32 to vector<4x14xf32>
      %269 = arith.maximumf %267, %268 : vector<4x14xf32>
      %cst_130 = arith.constant 1.9773587 : f32
      %270 = vector.broadcast %cst_130 : f32 to vector<4x14xf32>
      %271 = arith.mulf %270, %269 : vector<4x14xf32>
      %cst_131 = arith.constant 0.977358698 : f32
      %272 = vector.broadcast %cst_131 : f32 to vector<4x14xf32>
      %273 = arith.mulf %272, %260 : vector<4x14xf32>
      %274 = arith.subf %271, %273 : vector<4x14xf32>
      %cst_132 = arith.constant dense<0.000000e+00> : vector<4x14xf32>
      %275 = tpu.matmul %274, %1, %cst_132 {dimension_numbers = #tpu.dot_dimension_numbers<[1], [0], [0], [1], [0, 0, 1, 1], [], []>} : vector<4x14xf32>, vector<14x14xf32>, vector<4x14xf32> -> vector<4x14xf32>
      %276 = arith.subf %275, %3 : vector<4x14xf32>
      %cst_133 = arith.constant 0.000000e+00 : f32
      %277 = vector.broadcast %cst_133 : f32 to vector<4x14xf32>
      %278 = arith.maximumf %276, %277 : vector<4x14xf32>
      %cst_134 = arith.constant 1.9773587 : f32
      %279 = vector.broadcast %cst_134 : f32 to vector<4x14xf32>
      %280 = arith.mulf %279, %278 : vector<4x14xf32>
      %cst_135 = arith.constant 0.977358698 : f32
      %281 = vector.broadcast %cst_135 : f32 to vector<4x14xf32>
      %282 = arith.mulf %281, %269 : vector<4x14xf32>
      %283 = arith.subf %280, %282 : vector<4x14xf32>
      %cst_136 = arith.constant dense<0.000000e+00> : vector<4x14xf32>
      %284 = tpu.matmul %283, %1, %cst_136 {dimension_numbers = #tpu.dot_dimension_numbers<[1], [0], [0], [1], [0, 0, 1, 1], [], []>} : vector<4x14xf32>, vector<14x14xf32>, vector<4x14xf32> -> vector<4x14xf32>
      %285 = arith.subf %284, %3 : vector<4x14xf32>
      %cst_137 = arith.constant 0.000000e+00 : f32
      %286 = vector.broadcast %cst_137 : f32 to vector<4x14xf32>
      %287 = arith.maximumf %285, %286 : vector<4x14xf32>
      %cst_138 = arith.constant 1.9773587 : f32
      %288 = vector.broadcast %cst_138 : f32 to vector<4x14xf32>
      %289 = arith.mulf %288, %287 : vector<4x14xf32>
      %cst_139 = arith.constant 0.977358698 : f32
      %290 = vector.broadcast %cst_139 : f32 to vector<4x14xf32>
      %291 = arith.mulf %290, %278 : vector<4x14xf32>
      %292 = arith.subf %289, %291 : vector<4x14xf32>
      %cst_140 = arith.constant dense<0.000000e+00> : vector<4x14xf32>
      %293 = tpu.matmul %292, %1, %cst_140 {dimension_numbers = #tpu.dot_dimension_numbers<[1], [0], [0], [1], [0, 0, 1, 1], [], []>} : vector<4x14xf32>, vector<14x14xf32>, vector<4x14xf32> -> vector<4x14xf32>
      %294 = arith.subf %293, %3 : vector<4x14xf32>
      %cst_141 = arith.constant 0.000000e+00 : f32
      %295 = vector.broadcast %cst_141 : f32 to vector<4x14xf32>
      %296 = arith.maximumf %294, %295 : vector<4x14xf32>
      %cst_142 = arith.constant 1.9773587 : f32
      %297 = vector.broadcast %cst_142 : f32 to vector<4x14xf32>
      %298 = arith.mulf %297, %296 : vector<4x14xf32>
      %cst_143 = arith.constant 0.977358698 : f32
      %299 = vector.broadcast %cst_143 : f32 to vector<4x14xf32>
      %300 = arith.mulf %299, %287 : vector<4x14xf32>
      %301 = arith.subf %298, %300 : vector<4x14xf32>
      %302 = arith.subf %296, %arg6 : vector<4x14xf32>
      %303 = math.absf %302 : vector<4x14xf32>
      %304 = vector.shape_cast %303 : vector<4x14xf32> to vector<1x4x14xf32>
      %cst_144 = arith.constant dense<0xFF800000> : vector<1xf32>
      %305 = vector.multi_reduction <maximumf>, %304, %cst_144 [1, 2] : vector<1x4x14xf32> to vector<1xf32>
      %306 = vector.shape_cast %305 : vector<1xf32> to vector<1x1x1xf32>
      %307 = vector.extract %306[0, 0, 0] : f32 from vector<1x1x1xf32>
      %c1_i32 = arith.constant 1 : i32
      %308 = arith.addi %arg8, %c1_i32 : i32
      scf.yield %296, %301, %308, %307 : vector<4x14xf32>, vector<4x14xf32>, i32, f32
    }
    %c0_7 = arith.constant 0 : index
    %c0_8 = arith.constant 0 : index
    %6 = vector.load %arg3[%c0_7, %c0_8] : memref<14x15xf32, #tpu.memory_space<vmem>>, vector<14x15xf32>
    %cst_9 = arith.constant dense<0.000000e+00> : vector<4x15xf32>
    %7 = tpu.matmul %5#0, %6, %cst_9 {dimension_numbers = #tpu.dot_dimension_numbers<[1], [0], [0], [1], [0, 0, 1, 1], [], []>} : vector<4x14xf32>, vector<14x15xf32>, vector<4x15xf32> -> vector<4x15xf32>
    %8 = arith.addf %0, %7 : vector<4x15xf32>
    %c0_10 = arith.constant 0 : index
    %c0_11 = arith.constant 0 : index
    %9 = vector.load %arg4[%c0_10, %c0_11] : memref<15x15xf32, #tpu.memory_space<vmem>>, vector<15x15xf32>
    %cst_12 = arith.constant dense<0.000000e+00> : vector<4x15xf32>
    %10 = tpu.matmul %8, %9, %cst_12 {dimension_numbers = #tpu.dot_dimension_numbers<[1], [0], [0], [1], [0, 0, 1, 1], [], []>} : vector<4x15xf32>, vector<15x15xf32>, vector<4x15xf32> -> vector<4x15xf32>
    %cst_13 = arith.constant 0.000000e+00 : f32
    %11 = vector.broadcast %cst_13 : f32 to vector<4x15xf32>
    %12 = arith.subf %11, %10 : vector<4x15xf32>
    %c0_14 = arith.constant 0 : index
    %c0_15 = arith.constant 0 : index
    %13 = vector.load %arg5[%c0_14, %c0_15] : memref<4x15xf32, #tpu.memory_space<vmem>>, vector<4x15xf32>
    tpu.vector_store %arg5[%c0_14, %c0_15], %12 {strides = array<i32>} : memref<4x15xf32, #tpu.memory_space<vmem>>, vector<4x15xf32>,
    return
  }
}

</mosaic_0001>

<bundles_post_ra>
// kernel: tpu_custom_call.1
= control target key start
LH: loop header
LB: loop body
LE: loop exit
PB: predicated region body
PF: predicated region fallthrough
CT: control target
= control target key end

     0   :  { %10 = vsyncpa [#allocation3], 0  ;;  %s4103_s0 = inlined_call_operand.hbm [shape: f32[4,15], index: 0, kind: input, shape index: {}]   ;;  %s4104_s1 = inlined_call_operand.hbm [shape: f32[14,14], index: 1, kind: input, shape index: {}]   ;;  %s4105_s2 = inlined_call_operand.hbm [shape: f32[15,14], index: 2, kind: input, shape index: {}]   ;;  %s4106_s3 = inlined_call_operand.hbm [shape: f32[14,15], index: 3, kind: input, shape index: {}]   ;;  %s4107_s4 = inlined_call_operand.hbm [shape: f32[15,15], index: 4, kind: input, shape index: {}]   ;;  %s4108_s5 = inlined_call_operand.hbm [shape: f32[4,15], index: 5, kind: output, shape index: {}]  }
   0x1   :  { %11 = vsyncpa [#allocation6], 0 }
   0x2   :  { %12 = vsyncpa [#allocation9], 0 }
   0x3   :  { %13 = vsyncpa [#allocation4], 0  ;;  %s3655_s18 = smov [#allocation5]   ;;  %s3491_s22 = scalar_lea.hbm %s4104_s1, 256 }
   0x4   :  { %s29_s19 = sshll.u32 %s3655_s18, 4  ;;  %p3492_p0 = scmp.ne.s32.totalorder %s4104_s1, %s3491_s22  ;;  %s30_s19 = int_to_ptr.vmem [resolvable:$true] %s29_s19 }
   0x5   :  { %p3495_p1 = scmp.lt.u32.totalorder %s3491_s22, %s4104_s1 }
   0x7   :  { %p3497_p2 = pnand %p3495_p1, %p3492_p0 }
   0x9   :  { %3500 = shalt.err (!%p3497_p2)
}
   0xa   :  { %s3501_s27 = scalar_lea.vmem %s30_s19, 256  ;;  %p3506_p4 = scmp.lt.s32.totalorder %s30_s19, %s30_s19 }
   0xb   :  { %p3502_p3 = scmp.ne.s32.totalorder %s30_s19, %s3501_s27  ;;  %p3507_p5 = scmp.lt.s32.totalorder %s3501_s27, %s3501_s27 }
   0xd   :  { %p3508_p6 = por %p3507_p5, %p3506_p4 }
   0xf   :  { %p3509_p7 = pnand %p3508_p6, %p3502_p3 }
  0x11   :  { %3512 = shalt.err (!%p3509_p7)
}
  0x12   :  { %s3656_s28 = smov 128   ;;  %s3657_s29 = smov 8  }
  0x13   :  { %35 = dma.hbm_to_vmem [thread:$0]  %s4104_s1, 256, %s30_s19, [#allocation6], %s3656_s28, %s3656_s28, %s3657_s29  }
  0x14   :  { %s3658_s7 = smov [#allocation8]   ;;  %s3659_s9 = smov [#allocation2]  }
  0x15   :  { %s53_s8 = sshll.u32 %s3658_s7, 4  ;;  %s20_s10 = sshll.u32 %s3659_s9, 4  ;;  %s54_s8 = int_to_ptr.vmem [resolvable:$true] %s53_s8  ;;  %s21_s10 = int_to_ptr.vmem [resolvable:$true] %s20_s10 }
  0x16   :  { %s3513_s13 = scalar_lea.hbm %s4106_s3, 256 }
  0x17   :  { %p3514_p8 = scmp.ne.s32.totalorder %s4106_s3, %s3513_s13  ;;  %p3517_p9 = scmp.lt.u32.totalorder %s3513_s13, %s4106_s3 }
  0x19   :  { %p3519_p10 = pnand %p3517_p9, %p3514_p8 }
  0x1b   :  { %3522 = shalt.err (!%p3519_p10)
}
  0x1c   :  { %s3523_s1 = scalar_lea.vmem %s54_s8, 256  ;;  %p3528_p12 = scmp.lt.s32.totalorder %s54_s8, %s54_s8 }
  0x1d   :  { %p3524_p11 = scmp.ne.s32.totalorder %s54_s8, %s3523_s1  ;;  %p3529_p13 = scmp.lt.s32.totalorder %s3523_s1, %s3523_s1 }
  0x1f   :  { %p3530_p0 = por %p3529_p13, %p3528_p12 }
  0x21   :  { %p3531_p1 = pnand %p3530_p0, %p3524_p11 }
  0x23   :  { %3534 = shalt.err (!%p3531_p1)
}
  0x24   :  { %59 = dma.hbm_to_vmem [thread:$0]  %s4106_s3, 256, %s54_s8, [#allocation9], %s3656_s28, %s3656_s28, %s3657_s29  }
  0x25   :  { %s3535_s22 = scalar_lea.hbm %s4103_s0, 64 }
  0x26   :  { %p3536_p2 = scmp.ne.s32.totalorder %s4103_s0, %s3535_s22  ;;  %p3539_p3 = scmp.lt.u32.totalorder %s3535_s22, %s4103_s0 }
  0x28   :  { %p3541_p4 = pnand %p3539_p3, %p3536_p2 }
  0x2a   :  { %3544 = shalt.err (!%p3541_p4)
}
  0x2b   :  { %s3545_s27 = scalar_lea.vmem %s21_s10, 64  ;;  %p3550_p6 = scmp.lt.s32.totalorder %s21_s10, %s21_s10 }
  0x2c   :  { %p3546_p5 = scmp.ne.s32.totalorder %s21_s10, %s3545_s27  ;;  %p3551_p7 = scmp.lt.s32.totalorder %s3545_s27, %s3545_s27 }
  0x2e   :  { %p3552_p8 = por %p3551_p7, %p3550_p6 }
  0x30   :  { %p3553_p9 = pnand %p3552_p8, %p3546_p5 }
  0x32   :  { %3556 = shalt.err (!%p3553_p9)
}
  0x33   :  { %23 = dma.hbm_to_vmem [thread:$0]  %s4103_s0, 64, %s21_s10, [#allocation3]  }
  0x34   :  { %s3660_s6 = smov [#allocation7]   ;;  %s3661_s8 = smov [#allocation10]  }
  0x35   :  { %s41_s7 = sshll.u32 %s3660_s6, 4  ;;  %s65_s9 = sshll.u32 %s3661_s8, 4  ;;  %s42_s7 = int_to_ptr.vmem [resolvable:$true] %s41_s7  ;;  %s66_s9 = int_to_ptr.vmem [resolvable:$true] %s65_s9 }
  0x36   :  { %s3557_s13 = scalar_lea.hbm %s4105_s2, 256 }
  0x37   :  { %p3558_p10 = scmp.ne.s32.totalorder %s4105_s2, %s3557_s13  ;;  %p3561_p11 = scmp.lt.u32.totalorder %s3557_s13, %s4105_s2 }
  0x39   :  { %p3563_p12 = pnand %p3561_p11, %p3558_p10 }
  0x3b   :  { %3566 = shalt.err (!%p3563_p12)
}
  0x3c   :  { %s3567_s0 = scalar_lea.vmem %s42_s7, 256  ;;  %p3572_p0 = scmp.lt.s32.totalorder %s42_s7, %s42_s7 }
  0x3d   :  { %p3568_p13 = scmp.ne.s32.totalorder %s42_s7, %s3567_s0  ;;  %p3573_p1 = scmp.lt.s32.totalorder %s3567_s0, %s3567_s0 }
  0x3f   :  { %p3574_p2 = por %p3573_p1, %p3572_p0 }
  0x41   :  { %p3575_p3 = pnand %p3574_p2, %p3568_p13 }
  0x43   :  { %3578 = shalt.err (!%p3575_p3)
}
  0x44   :  { %47 = dma.hbm_to_vmem [thread:$0]  %s4105_s2, 256, %s42_s7, [#allocation6], %s3656_s28, %s3656_s28, %s3657_s29  }
  0x45   :  { %s3579_s20 = scalar_lea.hbm %s4107_s4, 256 }
  0x46   :  { %p3580_p4 = scmp.ne.s32.totalorder %s4107_s4, %s3579_s20  ;;  %p3583_p5 = scmp.lt.u32.totalorder %s3579_s20, %s4107_s4 }
  0x48   :  { %p3585_p6 = pnand %p3583_p5, %p3580_p4 }
  0x4a   :  { %3588 = shalt.err (!%p3585_p6)
}
  0x4b   :  { %s3589_s25 = scalar_lea.vmem %s66_s9, 256  ;;  %p3594_p8 = scmp.lt.s32.totalorder %s66_s9, %s66_s9 }
  0x4c   :  { %p3590_p7 = scmp.ne.s32.totalorder %s66_s9, %s3589_s25  ;;  %p3595_p9 = scmp.lt.s32.totalorder %s3589_s25, %s3589_s25 }
  0x4e   :  { %p3596_p10 = por %p3595_p9, %p3594_p8 }
  0x50   :  { %p3597_p11 = pnand %p3596_p10, %p3590_p7 }
  0x52   :  { %3600 = shalt.err (!%p3597_p11)
}
  0x53   :  { %71 = dma.hbm_to_vmem [thread:$0]  %s4107_s4, 256, %s66_s9, [#allocation9], %s3656_s28, %s3656_s28, %s3657_s29  }
  0x54   :  { %3635 = dma.done.wait [#allocation3], 64  }
  0x55   :  { %3636 = vsyncadd [#allocation3], 4294967232 }
  0x56   :  { %3637 = dma.done.wait [#allocation6], 512  }
  0x57   :  { %3638 = vsyncadd [#allocation6], 4294966784 }
  0x58   :  { %3639 = dma.done.wait [#allocation9], 512  }
  0x59   :  { %3640 = vsyncadd [#allocation9], 4294966784  ;;  %v3662_v0 = vmov 0.0|0.0   ;;  %vm3663_vm0 = vmmov 0   ;;  %v3664_v1 = vmov 0.0   ;;  %vm96_vm1 = vcmask 1046528  }
  0x5a   :  { %3309 = vmatprep.subr.bf16.mxu0 %v3662_v0  ;;  %3068 = vmatprep.mubr.msk.f32.mxu0 %vm3663_vm0, %v3664_v1  ;;  %v3776_v2 = vld [vmem:[#allocation5] sm:$0xff]  ;;  %v3778_v3 = vld [vmem:[#allocation5 + $0x8] sm:$0x3f]  ;;  %v90_v4 = vld [vmem:[#allocation7] sm:$0xff]  ;;  %vm3665_vm2 = vmmov 1   ;;  %vm92_vm4 = vcmask 121856  }
  0x5b   :  { %v91_v5 = vld [vmem:[#allocation7 + $0x8] sm:$0x7f]  ;;  %vm3780_vm3 = vmpackc.low %vm96_vm1, %vm3665_vm2  ;;  %s3792_s4 = smov 0   ;;  %v3794_v11 = vmov 0.0   ;;  %v3796_v12 = vmov 0.0  }
  0x5c   :  { %v3310_v7 = vpack.c.bf16 %v91_v5, %v90_v4  ;;  %v3786_v8 = vld [vmem:[#allocation2] sm:$0xf] }
  0x5e   :  { %3312 = vmatpush3.bf16.msk.msra.mxu0 %vm3780_vm3, %v3310_v7 }
  0x61   :  { %3069 = vmatmul.mubr.msk.f32.vlgmr.msra.gmra.mrb[0].mxu0 %vm92_vm4, %v3786_v8 }
 0x134   :  { %v3790_v9 = vpop.f32.mrb[0].mxu0 }
 0x135   :  { %v3070_v10 = vpop.f32.mrb[1].mxu0 }
 0x136 LB: > { %vm185_vm5 = vcmask 1045504   ;;  %v3807_v13 = vpack.c.bf16 %v3778_v3, %v3776_v2  ;;  %v3666_v14 = vmov 0.0|0.0   ;;  %vm3667_vm6 = vmmov 1   ;;  %s2695_s4 = sadd.s32 1, %s3645_s4   ;;  %v3653_v12 = vphi %v3796_v12, %v4113_v12   ;;  %v3649_v11 = vphi %v3794_v11, %v2681_v11   ;;  %s3645_s4 = sphi %s3792_s4, %s2695_s4  }
 0x137   : > { %3313 = vmatprep.subr.bf16.mxu0 %v3666_v14  ;;  %vm3810_vm7 = vmpackc.low %vm185_vm5, %vm3667_vm6  ;;  %3317 = vmatprep.subr.bf16.mxu1 %v3666_v14  ;;  %vm3668_vm8 = vmmov 0   ;;  %v3669_v16 = vmov 0.0   ;;  %vm181_vm9 = vcmask 113664   ;;  %v262_v21 = vmul.f32 0.9773587, %v3653_v12  ;;  %p176_p13 = scmp.lt.s32.totalorder %s2695_s4, 256 }
 0x138   : > { %3316 = vmatpush3.bf16.msk.msra.mxu0 %vm3810_vm7, %v3807_v13  ;;  %3075 = vmatprep.mubr.msk.f32.mxu0 %vm3668_vm8, %v3669_v16  ;;  %vm2684_vm10 = vcmask 109568  }
 0x139   : > { %3320 = vmatpush3.bf16.msk.msra.mxu1 %vm3810_vm7, %v3807_v13  ;;  %3082 = vmatprep.mubr.msk.f32.mxu1 %vm3668_vm8, %v3669_v16 }
 0x13a   : > { %3321 = vmatprep.subr.bf16.mxu0 %v3666_v14  ;;  %3325 = vmatprep.subr.bf16.mxu1 %v3666_v14 }
 0x13b   : > { %3076 = vmatmul.mubr.msk.f32.vlgmr.msra.gmra.mrb[0].mxu0 %vm181_vm9, %v3649_v11 }
 0x13c   : > { %3324 = vmatpush3.bf16.msk.msra.mxu0 %vm3810_vm7, %v3807_v13  ;;  %3089 = vmatprep.mubr.msk.f32.mxu0 %vm3668_vm8, %v3669_v16 }
 0x13d   : > { %3329 = vmatprep.subr.bf16.mxu0 %v3666_v14 }
 0x20e   : > { %v255_v17 = vpop.f32.mrb[0].mxu0 }
 0x20f   : > { %v259_v18 = vsub.f32 %v255_v17, %v3790_v9  ;;  %v3077_v19 = vpop.f32.mrb[1].mxu0 }
 0x211   : > { %v260_v20 = vmax.f32 %v259_v18, 0.0 }
 0x213   : > { %v261_v22 = vmul.f32 1.9773587, %v260_v20  ;;  %v340_v28 = vmul.f32 0.9773587, %v260_v20 }
 0x215   : > { %v263_v23 = vsub.f32 %v261_v22, %v262_v21 }
 0x217   : > { %3083 = vmatmul.mubr.msk.f32.vlgmr.msra.gmra.mrb[0].mxu1 %vm181_vm9, %v263_v23 }
 0x218   : > { %3328 = vmatpush3.bf16.msk.msra.mxu1 %vm3810_vm7, %v3807_v13  ;;  %3096 = vmatprep.mubr.msk.f32.mxu1 %vm3668_vm8, %v3669_v16 }
 0x219   : > { %3333 = vmatprep.subr.bf16.mxu1 %v3666_v14 }
 0x2ea   : > { %v333_v24 = vpop.f32.mrb[0].mxu1 }
 0x2eb   : > { %v337_v25 = vsub.f32 %v333_v24, %v3790_v9  ;;  %v3084_v26 = vpop.f32.mrb[1].mxu1 }
 0x2ed   : > { %v338_v27 = vmax.f32 %v337_v25, 0.0 }
 0x2ef   : > { %v339_v29 = vmul.f32 1.9773587, %v338_v27  ;;  %v418_v35 = vmul.f32 0.9773587, %v338_v27 }
 0x2f1   : > { %v341_v30 = vsub.f32 %v339_v29, %v340_v28 }
 0x2f3   : > { %3090 = vmatmul.mubr.msk.f32.vlgmr.msra.gmra.mrb[2].mxu0 %vm181_vm9, %v341_v30 }
 0x2f4   : > { %3332 = vmatpush3.bf16.msk.msra.mxu0 %vm3810_vm7, %v3807_v13  ;;  %3103 = vmatprep.mubr.msk.f32.mxu0 %vm3668_vm8, %v3669_v16 }
 0x2f5   : > { %3337 = vmatprep.subr.bf16.mxu0 %v3666_v14 }
 0x3c6   : > { %v411_v31 = vpop.f32.mrb[2].mxu0 }
 0x3c7   : > { %v415_v32 = vsub.f32 %v411_v31, %v3790_v9  ;;  %v3091_v33 = vpop.f32.mrb[3].mxu0 }
 0x3c9   : > { %v416_v34 = vmax.f32 %v415_v32, 0.0 }
 0x3cb   : > { %v417_v36 = vmul.f32 1.9773587, %v416_v34  ;;  %v496_v42 = vmul.f32 0.9773587, %v416_v34 }
 0x3cd   : > { %v419_v37 = vsub.f32 %v417_v36, %v418_v35 }
 0x3cf   : > { %3097 = vmatmul.mubr.msk.f32.vlgmr.msra.gmra.mrb[2].mxu1 %vm181_vm9, %v419_v37 }
 0x3d0   : > { %3336 = vmatpush3.bf16.msk.msra.mxu1 %vm3810_vm7, %v3807_v13  ;;  %3110 = vmatprep.mubr.msk.f32.mxu1 %vm3668_vm8, %v3669_v16 }
 0x3d1   : > { %3341 = vmatprep.subr.bf16.mxu1 %v3666_v14 }
 0x4a2   : > { %v489_v38 = vpop.f32.mrb[2].mxu1 }
 0x4a3   : > { %v493_v39 = vsub.f32 %v489_v38, %v3790_v9  ;;  %v3098_v40 = vpop.f32.mrb[3].mxu1 }
 0x4a5   : > { %v494_v41 = vmax.f32 %v493_v39, 0.0 }
 0x4a7   : > { %v495_v43 = vmul.f32 1.9773587, %v494_v41  ;;  %v574_v49 = vmul.f32 0.9773587, %v494_v41 }
 0x4a9   : > { %v497_v44 = vsub.f32 %v495_v43, %v496_v42 }
 0x4ab   : > { %3104 = vmatmul.mubr.msk.f32.vlgmr.msra.gmra.mrb[4].mxu0 %vm181_vm9, %v497_v44 }
 0x4ac   : > { %3340 = vmatpush3.bf16.msk.msra.mxu0 %vm3810_vm7, %v3807_v13  ;;  %3117 = vmatprep.mubr.msk.f32.mxu0 %vm3668_vm8, %v3669_v16 }
 0x4ad   : > { %3345 = vmatprep.subr.bf16.mxu0 %v3666_v14 }
 0x57e   : > { %v567_v45 = vpop.f32.mrb[4].mxu0 }
 0x57f   : > { %v571_v46 = vsub.f32 %v567_v45, %v3790_v9  ;;  %v3105_v47 = vpop.f32.mrb[5].mxu0 }
 0x581   : > { %v572_v48 = vmax.f32 %v571_v46, 0.0 }
 0x583   : > { %v573_v50 = vmul.f32 1.9773587, %v572_v48  ;;  %v652_v56 = vmul.f32 0.9773587, %v572_v48 }
 0x585   : > { %v575_v51 = vsub.f32 %v573_v50, %v574_v49 }
 0x587   : > { %3111 = vmatmul.mubr.msk.f32.vlgmr.msra.gmra.mrb[4].mxu1 %vm181_vm9, %v575_v51 }
 0x588   : > { %3344 = vmatpush3.bf16.msk.msra.mxu1 %vm3810_vm7, %v3807_v13  ;;  %3124 = vmatprep.mubr.msk.f32.mxu1 %vm3668_vm8, %v3669_v16 }
 0x589   : > { %3349 = vmatprep.subr.bf16.mxu1 %v3666_v14 }
 0x65a   : > { %v645_v52 = vpop.f32.mrb[4].mxu1 }
 0x65b   : > { %v649_v53 = vsub.f32 %v645_v52, %v3790_v9  ;;  %v3112_v54 = vpop.f32.mrb[5].mxu1 }
 0x65d   : > { %v650_v55 = vmax.f32 %v649_v53, 0.0 }
 0x65f   : > { %v651_v57 = vmul.f32 1.9773587, %v650_v55  ;;  %v730_v63 = vmul.f32 0.9773587, %v650_v55 }
 0x661   : > { %v653_v58 = vsub.f32 %v651_v57, %v652_v56 }
 0x663   : > { %3118 = vmatmul.mubr.msk.f32.vlgmr.msra.gmra.mrb[6].mxu0 %vm181_vm9, %v653_v58 }
 0x664   : > { %3348 = vmatpush3.bf16.msk.msra.mxu0 %vm3810_vm7, %v3807_v13  ;;  %3131 = vmatprep.mubr.msk.f32.mxu0 %vm3668_vm8, %v3669_v16 }
 0x665   : > { %3353 = vmatprep.subr.bf16.mxu0 %v3666_v14 }
 0x736   : > { %v723_v59 = vpop.f32.mrb[6].mxu0 }
 0x737   : > { %v727_v60 = vsub.f32 %v723_v59, %v3790_v9  ;;  %v3119_v61 = vpop.f32.mrb[7].mxu0 }
 0x739   : > { %v728_v62 = vmax.f32 %v727_v60, 0.0 }
 0x73b   : > { %v729_v4 = vmul.f32 1.9773587, %v728_v62  ;;  %v808_v18 = vmul.f32 0.9773587, %v728_v62 }
 0x73d   : > { %v731_v5 = vsub.f32 %v729_v4, %v730_v63 }
 0x73f   : > { %3125 = vmatmul.mubr.msk.f32.vlgmr.msra.gmra.mrb[6].mxu1 %vm181_vm9, %v731_v5 }
 0x740   : > { %3352 = vmatpush3.bf16.msk.msra.mxu1 %vm3810_vm7, %v3807_v13  ;;  %3138 = vmatprep.mubr.msk.f32.mxu1 %vm3668_vm8, %v3669_v16 }
 0x741   : > { %3357 = vmatprep.subr.bf16.mxu1 %v3666_v14 }
 0x812   : > { %v801_v7 = vpop.f32.mrb[6].mxu1 }
 0x813   : > { %v805_v10 = vsub.f32 %v801_v7, %v3790_v9  ;;  %v3126_v11 = vpop.f32.mrb[7].mxu1 }
 0x815   : > { %v806_v17 = vmax.f32 %v805_v10, 0.0 }
 0x817   : > { %v807_v19 = vmul.f32 1.9773587, %v806_v17  ;;  %v886_v25 = vmul.f32 0.9773587, %v806_v17 }
 0x819   : > { %v809_v20 = vsub.f32 %v807_v19, %v808_v18 }
 0x81b   : > { %3132 = vmatmul.mubr.msk.f32.vlgmr.msra.gmra.mrb[8].mxu0 %vm181_vm9, %v809_v20 }
 0x81c   : > { %3356 = vmatpush3.bf16.msk.msra.mxu0 %vm3810_vm7, %v3807_v13  ;;  %3145 = vmatprep.mubr.msk.f32.mxu0 %vm3668_vm8, %v3669_v16 }
 0x81d   : > { %3361 = vmatprep.subr.bf16.mxu0 %v3666_v14 }
 0x8ee   : > { %v879_v21 = vpop.f32.mrb[8].mxu0 }
 0x8ef   : > { %v883_v22 = vsub.f32 %v879_v21, %v3790_v9  ;;  %v3133_v23 = vpop.f32.mrb[9].mxu0 }
 0x8f1   : > { %v884_v24 = vmax.f32 %v883_v22, 0.0 }
 0x8f3   : > { %v885_v26 = vmul.f32 1.9773587, %v884_v24  ;;  %v964_v32 = vmul.f32 0.9773587, %v884_v24 }
 0x8f5   : > { %v887_v27 = vsub.f32 %v885_v26, %v886_v25 }
 0x8f7   : > { %3139 = vmatmul.mubr.msk.f32.vlgmr.msra.gmra.mrb[8].mxu1 %vm181_vm9, %v887_v27 }
 0x8f8   : > { %3360 = vmatpush3.bf16.msk.msra.mxu1 %vm3810_vm7, %v3807_v13  ;;  %3152 = vmatprep.mubr.msk.f32.mxu1 %vm3668_vm8, %v3669_v16 }
 0x8f9   : > { %3365 = vmatprep.subr.bf16.mxu1 %v3666_v14 }
 0x9ca   : > { %v957_v28 = vpop.f32.mrb[8].mxu1 }
 0x9cb   : > { %v961_v29 = vsub.f32 %v957_v28, %v3790_v9  ;;  %v3140_v30 = vpop.f32.mrb[9].mxu1 }
 0x9cd   : > { %v962_v31 = vmax.f32 %v961_v29, 0.0 }
 0x9cf   : > { %v963_v33 = vmul.f32 1.9773587, %v962_v31  ;;  %v1042_v39 = vmul.f32 0.9773587, %v962_v31 }
 0x9d1   : > { %v965_v34 = vsub.f32 %v963_v33, %v964_v32 }
 0x9d3   : > { %3146 = vmatmul.mubr.msk.f32.vlgmr.msra.gmra.mrb[10].mxu0 %vm181_vm9, %v965_v34 }
 0x9d4   : > { %3364 = vmatpush3.bf16.msk.msra.mxu0 %vm3810_vm7, %v3807_v13  ;;  %3159 = vmatprep.mubr.msk.f32.mxu0 %vm3668_vm8, %v3669_v16 }
 0x9d5   : > { %3369 = vmatprep.subr.bf16.mxu0 %v3666_v14 }
 0xaa6   : > { %v1035_v35 = vpop.f32.mrb[10].mxu0 }
 0xaa7   : > { %v1039_v36 = vsub.f32 %v1035_v35, %v3790_v9  ;;  %v3147_v37 = vpop.f32.mrb[11].mxu0 }
 0xaa9   : > { %v1040_v38 = vmax.f32 %v1039_v36, 0.0 }
 0xaab   : > { %v1041_v40 = vmul.f32 1.9773587, %v1040_v38  ;;  %v1120_v46 = vmul.f32 0.9773587, %v1040_v38 }
 0xaad   : > { %v1043_v41 = vsub.f32 %v1041_v40, %v1042_v39 }
 0xaaf   : > { %3153 = vmatmul.mubr.msk.f32.vlgmr.msra.gmra.mrb[10].mxu1 %vm181_vm9, %v1043_v41 }
 0xab0   : > { %3368 = vmatpush3.bf16.msk.msra.mxu1 %vm3810_vm7, %v3807_v13  ;;  %3166 = vmatprep.mubr.msk.f32.mxu1 %vm3668_vm8, %v3669_v16 }
 0xab1   : > { %3373 = vmatprep.subr.bf16.mxu1 %v3666_v14 }
 0xb82   : > { %v1113_v42 = vpop.f32.mrb[10].mxu1 }
 0xb83   : > { %v1117_v43 = vsub.f32 %v1113_v42, %v3790_v9  ;;  %v3154_v44 = vpop.f32.mrb[11].mxu1 }
 0xb85   : > { %v1118_v45 = vmax.f32 %v1117_v43, 0.0 }
 0xb87   : > { %v1119_v47 = vmul.f32 1.9773587, %v1118_v45  ;;  %v1198_v53 = vmul.f32 0.9773587, %v1118_v45 }
 0xb89   : > { %v1121_v48 = vsub.f32 %v1119_v47, %v1120_v46 }
 0xb8b   : > { %3160 = vmatmul.mubr.msk.f32.vlgmr.msra.gmra.mrb[12].mxu0 %vm181_vm9, %v1121_v48 }
 0xb8c   : > { %3372 = vmatpush3.bf16.msk.msra.mxu0 %vm3810_vm7, %v3807_v13  ;;  %3173 = vmatprep.mubr.msk.f32.mxu0 %vm3668_vm8, %v3669_v16 }
 0xb8d   : > { %3377 = vmatprep.subr.bf16.mxu0 %v3666_v14 }
 0xc5e   : > { %v1191_v49 = vpop.f32.mrb[12].mxu0 }
 0xc5f   : > { %v1195_v50 = vsub.f32 %v1191_v49, %v3790_v9  ;;  %v3161_v51 = vpop.f32.mrb[13].mxu0 }
 0xc61   : > { %v1196_v52 = vmax.f32 %v1195_v50, 0.0 }
 0xc63   : > { %v1197_v54 = vmul.f32 1.9773587, %v1196_v52  ;;  %v1276_v60 = vmul.f32 0.9773587, %v1196_v52 }
 0xc65   : > { %v1199_v55 = vsub.f32 %v1197_v54, %v1198_v53 }
 0xc67   : > { %3167 = vmatmul.mubr.msk.f32.vlgmr.msra.gmra.mrb[12].mxu1 %vm181_vm9, %v1199_v55 }
 0xc68   : > { %3376 = vmatpush3.bf16.msk.msra.mxu1 %vm3810_vm7, %v3807_v13  ;;  %3180 = vmatprep.mubr.msk.f32.mxu1 %vm3668_vm8, %v3669_v16 }
 0xc69   : > { %3381 = vmatprep.subr.bf16.mxu1 %v3666_v14 }
 0xd3a   : > { %v1269_v56 = vpop.f32.mrb[12].mxu1 }
 0xd3b   : > { %v1273_v57 = vsub.f32 %v1269_v56, %v3790_v9  ;;  %v3168_v58 = vpop.f32.mrb[13].mxu1 }
 0xd3d   : > { %v1274_v59 = vmax.f32 %v1273_v57, 0.0 }
 0xd3f   : > { %v1275_v61 = vmul.f32 1.9773587, %v1274_v59  ;;  %v1354_v10 = vmul.f32 0.9773587, %v1274_v59 }
 0xd41   : > { %v1277_v62 = vsub.f32 %v1275_v61, %v1276_v60 }
 0xd43   : > { %3174 = vmatmul.mubr.msk.f32.vlgmr.msra.gmra.mrb[14].mxu0 %vm181_vm9, %v1277_v62 }
 0xd44   : > { %3380 = vmatpush3.bf16.msk.msra.mxu0 %vm3810_vm7, %v3807_v13  ;;  %3187 = vmatprep.mubr.msk.f32.mxu0 %vm3668_vm8, %v3669_v16 }
 0xd45   : > { %3385 = vmatprep.subr.bf16.mxu0 %v3666_v14 }
 0xe16   : > { %v1347_v63 = vpop.f32.mrb[14].mxu0 }
 0xe17   : > { %v1351_v4 = vsub.f32 %v1347_v63, %v3790_v9  ;;  %v3175_v5 = vpop.f32.mrb[15].mxu0 }
 0xe19   : > { %v1352_v7 = vmax.f32 %v1351_v4, 0.0 }
 0xe1b   : > { %v1353_v11 = vmul.f32 1.9773587, %v1352_v7  ;;  %v1432_v22 = vmul.f32 0.9773587, %v1352_v7 }
 0xe1d   : > { %v1355_v17 = vsub.f32 %v1353_v11, %v1354_v10 }
 0xe1f   : > { %3181 = vmatmul.mubr.msk.f32.vlgmr.msra.gmra.mrb[14].mxu1 %vm181_vm9, %v1355_v17 }
 0xe20   : > { %3384 = vmatpush3.bf16.msk.msra.mxu1 %vm3810_vm7, %v3807_v13  ;;  %3194 = vmatprep.mubr.msk.f32.mxu1 %vm3668_vm8, %v3669_v16 }
 0xe21   : > { %3389 = vmatprep.subr.bf16.mxu1 %v3666_v14 }
 0xef2   : > { %v1425_v18 = vpop.f32.mrb[14].mxu1 }
 0xef3   : > { %v1429_v19 = vsub.f32 %v1425_v18, %v3790_v9  ;;  %v3182_v20 = vpop.f32.mrb[15].mxu1 }
 0xef5   : > { %v1430_v21 = vmax.f32 %v1429_v19, 0.0 }
 0xef7   : > { %v1431_v23 = vmul.f32 1.9773587, %v1430_v21  ;;  %v1510_v29 = vmul.f32 0.9773587, %v1430_v21 }
 0xef9   : > { %v1433_v24 = vsub.f32 %v1431_v23, %v1432_v22 }
 0xefb   : > { %3188 = vmatmul.mubr.msk.f32.vlgmr.msra.gmra.mrb[16].mxu0 %vm181_vm9, %v1433_v24 }
 0xefc   : > { %3388 = vmatpush3.bf16.msk.msra.mxu0 %vm3810_vm7, %v3807_v13  ;;  %3201 = vmatprep.mubr.msk.f32.mxu0 %vm3668_vm8, %v3669_v16 }
 0xefd   : > { %3393 = vmatprep.subr.bf16.mxu0 %v3666_v14 }
 0xfce   : > { %v1503_v25 = vpop.f32.mrb[16].mxu0 }
 0xfcf   : > { %v1507_v26 = vsub.f32 %v1503_v25, %v3790_v9  ;;  %v3189_v27 = vpop.f32.mrb[17].mxu0 }
 0xfd1   : > { %v1508_v28 = vmax.f32 %v1507_v26, 0.0 }
 0xfd3   : > { %v1509_v30 = vmul.f32 1.9773587, %v1508_v28  ;;  %v1588_v36 = vmul.f32 0.9773587, %v1508_v28 }
 0xfd5   : > { %v1511_v31 = vsub.f32 %v1509_v30, %v1510_v29 }
 0xfd7   : > { %3195 = vmatmul.mubr.msk.f32.vlgmr.msra.gmra.mrb[16].mxu1 %vm181_vm9, %v1511_v31 }
 0xfd8   : > { %3392 = vmatpush3.bf16.msk.msra.mxu1 %vm3810_vm7, %v3807_v13  ;;  %3208 = vmatprep.mubr.msk.f32.mxu1 %vm3668_vm8, %v3669_v16 }
 0xfd9   : > { %3397 = vmatprep.subr.bf16.mxu1 %v3666_v14 }
0x10aa   : > { %v1581_v32 = vpop.f32.mrb[16].mxu1 }
0x10ab   : > { %v1585_v33 = vsub.f32 %v1581_v32, %v3790_v9  ;;  %v3196_v34 = vpop.f32.mrb[17].mxu1 }
0x10ad   : > { %v1586_v35 = vmax.f32 %v1585_v33, 0.0 }
0x10af   : > { %v1587_v37 = vmul.f32 1.9773587, %v1586_v35  ;;  %v1666_v43 = vmul.f32 0.9773587, %v1586_v35 }
0x10b1   : > { %v1589_v38 = vsub.f32 %v1587_v37, %v1588_v36 }
0x10b3   : > { %3202 = vmatmul.mubr.msk.f32.vlgmr.msra.gmra.mrb[18].mxu0 %vm181_vm9, %v1589_v38 }
0x10b4   : > { %3396 = vmatpush3.bf16.msk.msra.mxu0 %vm3810_vm7, %v3807_v13  ;;  %3215 = vmatprep.mubr.msk.f32.mxu0 %vm3668_vm8, %v3669_v16 }
0x10b5   : > { %3401 = vmatprep.subr.bf16.mxu0 %v3666_v14 }
0x1186   : > { %v1659_v39 = vpop.f32.mrb[18].mxu0 }
0x1187   : > { %v1663_v40 = vsub.f32 %v1659_v39, %v3790_v9  ;;  %v3203_v41 = vpop.f32.mrb[19].mxu0 }
0x1189   : > { %v1664_v42 = vmax.f32 %v1663_v40, 0.0 }
0x118b   : > { %v1665_v44 = vmul.f32 1.9773587, %v1664_v42  ;;  %v1744_v50 = vmul.f32 0.9773587, %v1664_v42 }
0x118d   : > { %v1667_v45 = vsub.f32 %v1665_v44, %v1666_v43 }
0x118f   : > { %3209 = vmatmul.mubr.msk.f32.vlgmr.msra.gmra.mrb[18].mxu1 %vm181_vm9, %v1667_v45 }
0x1190   : > { %3400 = vmatpush3.bf16.msk.msra.mxu1 %vm3810_vm7, %v3807_v13  ;;  %3222 = vmatprep.mubr.msk.f32.mxu1 %vm3668_vm8, %v3669_v16 }
0x1191   : > { %3405 = vmatprep.subr.bf16.mxu1 %v3666_v14 }
0x1262   : > { %v1737_v46 = vpop.f32.mrb[18].mxu1 }
0x1263   : > { %v1741_v47 = vsub.f32 %v1737_v46, %v3790_v9  ;;  %v3210_v48 = vpop.f32.mrb[19].mxu1 }
0x1265   : > { %v1742_v49 = vmax.f32 %v1741_v47, 0.0 }
0x1267   : > { %v1743_v51 = vmul.f32 1.9773587, %v1742_v49  ;;  %v1822_v57 = vmul.f32 0.9773587, %v1742_v49 }
0x1269   : > { %v1745_v52 = vsub.f32 %v1743_v51, %v1744_v50 }
0x126b   : > { %3216 = vmatmul.mubr.msk.f32.vlgmr.msra.gmra.mrb[20].mxu0 %vm181_vm9, %v1745_v52 }
0x126c   : > { %3404 = vmatpush3.bf16.msk.msra.mxu0 %vm3810_vm7, %v3807_v13  ;;  %3229 = vmatprep.mubr.msk.f32.mxu0 %vm3668_vm8, %v3669_v16 }
0x126d   : > { %3409 = vmatprep.subr.bf16.mxu0 %v3666_v14 }
0x133e   : > { %v1815_v53 = vpop.f32.mrb[20].mxu0 }
0x133f   : > { %v1819_v54 = vsub.f32 %v1815_v53, %v3790_v9  ;;  %v3217_v55 = vpop.f32.mrb[21].mxu0 }
0x1341   : > { %v1820_v56 = vmax.f32 %v1819_v54, 0.0 }
0x1343   : > { %v1821_v58 = vmul.f32 1.9773587, %v1820_v56  ;;  %v1900_v4 = vmul.f32 0.9773587, %v1820_v56 }
0x1345   : > { %v1823_v59 = vsub.f32 %v1821_v58, %v1822_v57 }
0x1347   : > { %3223 = vmatmul.mubr.msk.f32.vlgmr.msra.gmra.mrb[20].mxu1 %vm181_vm9, %v1823_v59 }
0x1348   : > { %3408 = vmatpush3.bf16.msk.msra.mxu1 %vm3810_vm7, %v3807_v13  ;;  %3236 = vmatprep.mubr.msk.f32.mxu1 %vm3668_vm8, %v3669_v16 }
0x1349   : > { %3413 = vmatprep.subr.bf16.mxu1 %v3666_v14 }
0x141a   : > { %v1893_v60 = vpop.f32.mrb[20].mxu1 }
0x141b   : > { %v1897_v61 = vsub.f32 %v1893_v60, %v3790_v9  ;;  %v3224_v62 = vpop.f32.mrb[21].mxu1 }
0x141d   : > { %v1898_v63 = vmax.f32 %v1897_v61, 0.0 }
0x141f   : > { %v1899_v5 = vmul.f32 1.9773587, %v1898_v63  ;;  %v1978_v19 = vmul.f32 0.9773587, %v1898_v63 }
0x1421   : > { %v1901_v7 = vsub.f32 %v1899_v5, %v1900_v4 }
0x1423   : > { %3230 = vmatmul.mubr.msk.f32.vlgmr.msra.gmra.mrb[22].mxu0 %vm181_vm9, %v1901_v7 }
0x1424   : > { %3412 = vmatpush3.bf16.msk.msra.mxu0 %vm3810_vm7, %v3807_v13  ;;  %3243 = vmatprep.mubr.msk.f32.mxu0 %vm3668_vm8, %v3669_v16 }
0x1425   : > { %3417 = vmatprep.subr.bf16.mxu0 %v3666_v14 }
0x14f6   : > { %v1971_v10 = vpop.f32.mrb[22].mxu0 }
0x14f7   : > { %v1975_v11 = vsub.f32 %v1971_v10, %v3790_v9  ;;  %v3231_v17 = vpop.f32.mrb[23].mxu0 }
0x14f9   : > { %v1976_v18 = vmax.f32 %v1975_v11, 0.0 }
0x14fb   : > { %v1977_v20 = vmul.f32 1.9773587, %v1976_v18  ;;  %v2056_v26 = vmul.f32 0.9773587, %v1976_v18 }
0x14fd   : > { %v1979_v21 = vsub.f32 %v1977_v20, %v1978_v19 }
0x14ff   : > { %3237 = vmatmul.mubr.msk.f32.vlgmr.msra.gmra.mrb[22].mxu1 %vm181_vm9, %v1979_v21 }
0x1500   : > { %3416 = vmatpush3.bf16.msk.msra.mxu1 %vm3810_vm7, %v3807_v13  ;;  %3250 = vmatprep.mubr.msk.f32.mxu1 %vm3668_vm8, %v3669_v16 }
0x1501   : > { %3421 = vmatprep.subr.bf16.mxu1 %v3666_v14 }
0x15d2   : > { %v2049_v22 = vpop.f32.mrb[22].mxu1 }
0x15d3   : > { %v2053_v23 = vsub.f32 %v2049_v22, %v3790_v9  ;;  %v3238_v24 = vpop.f32.mrb[23].mxu1 }
0x15d5   : > { %v2054_v25 = vmax.f32 %v2053_v23, 0.0 }
0x15d7   : > { %v2055_v27 = vmul.f32 1.9773587, %v2054_v25  ;;  %v2134_v33 = vmul.f32 0.9773587, %v2054_v25 }
0x15d9   : > { %v2057_v28 = vsub.f32 %v2055_v27, %v2056_v26 }
0x15db   : > { %3244 = vmatmul.mubr.msk.f32.vlgmr.msra.gmra.mrb[24].mxu0 %vm181_vm9, %v2057_v28 }
0x15dc   : > { %3420 = vmatpush3.bf16.msk.msra.mxu0 %vm3810_vm7, %v3807_v13  ;;  %3257 = vmatprep.mubr.msk.f32.mxu0 %vm3668_vm8, %v3669_v16 }
0x15dd   : > { %3425 = vmatprep.subr.bf16.mxu0 %v3666_v14 }
0x16ae   : > { %v2127_v29 = vpop.f32.mrb[24].mxu0 }
0x16af   : > { %v2131_v30 = vsub.f32 %v2127_v29, %v3790_v9  ;;  %v3245_v31 = vpop.f32.mrb[25].mxu0 }
0x16b1   : > { %v2132_v32 = vmax.f32 %v2131_v30, 0.0 }
0x16b3   : > { %v2133_v34 = vmul.f32 1.9773587, %v2132_v32  ;;  %v2212_v40 = vmul.f32 0.9773587, %v2132_v32 }
0x16b5   : > { %v2135_v35 = vsub.f32 %v2133_v34, %v2134_v33 }
0x16b7   : > { %3251 = vmatmul.mubr.msk.f32.vlgmr.msra.gmra.mrb[24].mxu1 %vm181_vm9, %v2135_v35 }
0x16b8   : > { %3424 = vmatpush3.bf16.msk.msra.mxu1 %vm3810_vm7, %v3807_v13  ;;  %3264 = vmatprep.mubr.msk.f32.mxu1 %vm3668_vm8, %v3669_v16 }
0x16b9   : > { %3429 = vmatprep.subr.bf16.mxu1 %v3666_v14 }
0x178a   : > { %v2205_v36 = vpop.f32.mrb[24].mxu1 }
0x178b   : > { %v2209_v37 = vsub.f32 %v2205_v36, %v3790_v9  ;;  %v3252_v38 = vpop.f32.mrb[25].mxu1 }
0x178d   : > { %v2210_v39 = vmax.f32 %v2209_v37, 0.0 }
0x178f   : > { %v2211_v41 = vmul.f32 1.9773587, %v2210_v39  ;;  %v2290_v47 = vmul.f32 0.9773587, %v2210_v39 }
0x1791   : > { %v2213_v42 = vsub.f32 %v2211_v41, %v2212_v40 }
0x1793   : > { %3258 = vmatmul.mubr.msk.f32.vlgmr.msra.gmra.mrb[26].mxu0 %vm181_vm9, %v2213_v42 }
0x1794   : > { %3428 = vmatpush3.bf16.msk.msra.mxu0 %vm3810_vm7, %v3807_v13  ;;  %3271 = vmatprep.mubr.msk.f32.mxu0 %vm3668_vm8, %v3669_v16 }
0x1795   : > { %3433 = vmatprep.subr.bf16.mxu0 %v3666_v14 }
0x1866   : > { %v2283_v43 = vpop.f32.mrb[26].mxu0 }
0x1867   : > { %v2287_v44 = vsub.f32 %v2283_v43, %v3790_v9  ;;  %v3259_v45 = vpop.f32.mrb[27].mxu0 }
0x1869   : > { %v2288_v46 = vmax.f32 %v2287_v44, 0.0 }
0x186b   : > { %v2289_v48 = vmul.f32 1.9773587, %v2288_v46  ;;  %v2368_v54 = vmul.f32 0.9773587, %v2288_v46 }
0x186d   : > { %v2291_v49 = vsub.f32 %v2289_v48, %v2290_v47 }
0x186f   : > { %3265 = vmatmul.mubr.msk.f32.vlgmr.msra.gmra.mrb[26].mxu1 %vm181_vm9, %v2291_v49 }
0x1870   : > { %3432 = vmatpush3.bf16.msk.msra.mxu1 %vm3810_vm7, %v3807_v13  ;;  %3278 = vmatprep.mubr.msk.f32.mxu1 %vm3668_vm8, %v3669_v16 }
0x1871   : > { %3437 = vmatprep.subr.bf16.mxu1 %v3666_v14 }
0x1942   : > { %v2361_v50 = vpop.f32.mrb[26].mxu1 }
0x1943   : > { %v2365_v51 = vsub.f32 %v2361_v50, %v3790_v9  ;;  %v3266_v52 = vpop.f32.mrb[27].mxu1 }
0x1945   : > { %v2366_v53 = vmax.f32 %v2365_v51, 0.0 }
0x1947   : > { %v2367_v55 = vmul.f32 1.9773587, %v2366_v53  ;;  %v2446_v60 = vmul.f32 0.9773587, %v2366_v53 }
0x1949   : > { %v2369_v56 = vsub.f32 %v2367_v55, %v2368_v54 }
0x194b   : > { %3272 = vmatmul.mubr.msk.f32.vlgmr.msra.gmra.mrb[28].mxu0 %vm181_vm9, %v2369_v56 }
0x194c   : > { %3436 = vmatpush3.bf16.msk.msra.mxu0 %vm3810_vm7, %v3807_v13  ;;  %3285 = vmatprep.mubr.msk.f32.mxu0 %vm3668_vm8, %v3669_v16 }
0x1a1e   : > { %v2439_v57 = vpop.f32.mrb[28].mxu0 }
0x1a1f   : > { %v2443_v14 = vsub.f32 %v2439_v57, %v3790_v9  ;;  %v3273_v58 = vpop.f32.mrb[29].mxu0 }
0x1a21   : > { %v2444_v59 = vmax.f32 %v2443_v14, 0.0 }
0x1a23   : > { %v2445_v61 = vmul.f32 1.9773587, %v2444_v59  ;;  %v2524_v10 = vmul.f32 0.9773587, %v2444_v59 }
0x1a25   : > { %v2447_v62 = vsub.f32 %v2445_v61, %v2446_v60 }
0x1a27   : > { %3279 = vmatmul.mubr.msk.f32.vlgmr.msra.gmra.mrb[28].mxu1 %vm181_vm9, %v2447_v62 }
0x1a28   : > { %3440 = vmatpush3.bf16.msk.msra.mxu1 %vm3810_vm7, %v3807_v13  ;;  %3292 = vmatprep.mubr.msk.f32.mxu1 %vm3668_vm8, %v3669_v16 }
0x1afa   : > { %v2517_v63 = vpop.f32.mrb[28].mxu1 }
0x1afb   : > { %v2521_v4 = vsub.f32 %v2517_v63, %v3790_v9  ;;  %v3280_v5 = vpop.f32.mrb[29].mxu1 }
0x1afd   : > { %v2522_v7 = vmax.f32 %v2521_v4, 0.0 }
0x1aff   : > { %v2523_v11 = vmul.f32 1.9773587, %v2522_v7  ;;  %v2602_v22 = vmul.f32 0.9773587, %v2522_v7 }
0x1b01   : > { %v2525_v17 = vsub.f32 %v2523_v11, %v2524_v10 }
0x1b03   : > { %3286 = vmatmul.mubr.msk.f32.vlgmr.msra.gmra.mrb[30].mxu0 %vm181_vm9, %v2525_v17 }
0x1bd6   : > { %v2595_v18 = vpop.f32.mrb[30].mxu0 }
0x1bd7   : > { %v2599_v19 = vsub.f32 %v2595_v18, %v3790_v9  ;;  %v3287_v20 = vpop.f32.mrb[31].mxu0 }
0x1bd9   : > { %v2600_v21 = vmax.f32 %v2599_v19, 0.0 }
0x1bdb   : > { %v2601_v13 = vmul.f32 1.9773587, %v2600_v21  ;;  %v2680_v27 = vmul.f32 0.9773587, %v2600_v21 }
0x1bdd   : > { %v2603_v23 = vsub.f32 %v2601_v13, %v2602_v22 }
0x1bdf   : > { %3293 = vmatmul.mubr.msk.f32.vlgmr.msra.gmra.mrb[30].mxu1 %vm181_vm9, %v2603_v23 }
0x1cb2   : > { %v2673_v16 = vpop.f32.mrb[30].mxu1 }
0x1cb3   : > { %v2677_v24 = vsub.f32 %v2673_v16, %v3790_v9  ;;  %v3294_v25 = vpop.f32.mrb[31].mxu1 }
0x1cb5   : > { %v2678_v26 = vmax.f32 %v2677_v24, 0.0  }
0x1cb7   : > { %v2679_v28 = vmul.f32 1.9773587, %v2678_v26  ;;  %v2682_v29 = vsub.f32 %v2678_v26, %v3653_v12  ;;  %v4113_v12 = vmov %v2678_v26 }
0x1cb9   : > { %v2681_v11 = vsub.f32 %v2679_v28, %v2680_v27   ;;  %v2683_v30 = vand.u32 2147483647, %v2682_v29 }
0x1cbb   : > { %v2685_v31 = vsel %vm2684_vm10, %v2683_v30, -inf }
0x1cbc   : > { %2686 = vmax.xlane.f32.xlu0 %v2685_v31 }
0x1d49   : > { %v2687_v32 = vpop.xlane.xlu0 %2686 }
0x1d4a   : > { %v2688_v33 = vrot.slane %v2687_v32, 4 }
0x1d4c   : > { %v2689_v34 = vmax.f32 %v2687_v32, %v2688_v33 }
0x1d4e   : > { %v2690_v35 = vrot.slane %v2689_v34, 2 }
0x1d50   : > { %v2691_v36 = vmax.f32 %v2689_v34, %v2690_v35 }
0x1d52   : > { %v2692_v37 = vrot.slane %v2691_v36, 1 }
0x1d54   : > { %v2693_v38 = vmax.f32 %v2691_v36, %v2692_v37 }
0x1d56   : > { %3449 = vpush %v2693_v38 }
0x1d87   : > { %s3450_s28 = spop %3449 }
0x1d88   : > { %p175_p12 = scmp.gt.f32.partialorder %s3450_s28, 1e-05 }
0x1d8a   : > { %p177_p0 = pnand %p176_p13, %p175_p12 }
0x1d8b   :  { %3441 = vmatprep.subr.bf16.mxu0 (%p177_p0), %v3662_v0  ;;  %v2696_v12 = vld [vmem:[#allocation8] sm:$0xff] (%p177_p0)  ;;  %v2697_v39 = vld [vmem:[#allocation8 + $0x8] sm:$0x3f] (%p177_p0)  ;;  %3299 = vmatprep.mubr.msk.f32.mxu0 (%p177_p0), %vm3663_vm0, %v3664_v1  ;;  %v2777_v41 = vld [vmem:[#allocation10] sm:$0xff] (%p177_p0)  ;;  %s3670_s29 = smov (%p177_p0), [#allocation11]   ;;  %vm2856_vm11 = vcmask (%p177_p0), 117760  }
0x1d8c   :  { %180 = sbr.rel (!%p177_p0) target bundleno = 310 (0x136), region = 67  ;;  %v3442_v40 = vpack.c.bf16 (%p177_p0), %v2697_v39, %v2696_v12  ;;  %3445 = vmatprep.subr.bf16.mxu1 (%p177_p0), %v3662_v0  ;;  %3306 = vmatprep.mubr.msk.f32.mxu1 (%p177_p0), %vm3663_vm0, %v3664_v1  ;;  %v2778_v42 = vld [vmem:[#allocation10 + $0x8] sm:$0x7f] (%p177_p0)  ;;  %s2864_s27 = sshll.u32 (%p177_p0), %s3670_s29, 4  ;;  %s2865_s27 = int_to_ptr.vmem [resolvable:$true] %s2864_s27 }
0x1d8d   :  { %v3446_v2 = vpack.c.bf16 (%p177_p0), %v2778_v42, %v2777_v41  ;;  %s3601_s3 = scalar_lea.vmem (%p177_p0), %s2865_s27, 64  ;;  %p3606_p2 = scmp.lt.s32.totalorder (%p177_p0), %s2865_s27, %s2865_s27 }
0x1d8e   :  { %3444 = vmatpush3.bf16.msk.msra.mxu0 (%p177_p0), %vm3810_vm7, %v3442_v40  ;;  %p3602_p1 = scmp.ne.s32.totalorder (%p177_p0), %s2865_s27, %s3601_s3  ;;  %p3607_p3 = scmp.lt.s32.totalorder (%p177_p0), %s3601_s3, %s3601_s3 }
0x1d8f   :  { %3448 = vmatpush3.bf16.msk.msra.mxu1 (%p177_p0), %vm3780_vm3, %v3446_v2 }
0x1d90   :  { %p3608_p4 = por (%p177_p0), %p3607_p3, %p3606_p2 }
0x1d91   :  { %3300 = vmatmul.mubr.msk.f32.vlgmr.msra.gmra.mrb[0].mxu0 (%p177_p0), %vm181_vm9, %v2678_v26 }
0x1d92   :  { %p3609_p5 = pnand (%p177_p0), %p3608_p4, %p3602_p1 }
0x1e64   :  { %v2772_v3 = vpop.f32.mrb[0].mxu0 }
0x1e65   :  { %v2776_v9 = vadd.f32 %v2772_v3, %v3786_v8  ;;  %v3301_v43 = vpop.f32.mrb[1].mxu0 }
0x1e67   :  { %3307 = vmatmul.mubr.msk.f32.vlgmr.msra.gmra.mrb[0].mxu1 %vm92_vm4, %v2776_v9 }
0x1f3a   :  { %v2851_v0 = vpop.f32.mrb[0].mxu1 }
0x1f3b   :  { %v2855_v1 = vsub.f32 0.0, %v2851_v0  ;;  %v3308_v15 = vpop.f32.mrb[1].mxu1 }
0x1f3d   :  { %2857 = vst.msk [vmem:[#allocation11] sm:$0xf] %vm2856_vm11, %v2855_v1 }
0x1f3e   :  { %3612 = shalt.err (!%p3609_p5)
}
0x1f3f   :  { %s3613_s7 = scalar_lea.hbm %s4108_s5, 64 }
0x1f40   :  { %p3614_p6 = scmp.ne.s32.totalorder %s4108_s5, %s3613_s7  ;;  %p3617_p7 = scmp.lt.u32.totalorder %s3613_s7, %s4108_s5 }
0x1f42   :  { %p3619_p8 = pnand %p3617_p7, %p3614_p6 }
0x1f44   :  { %3622 = shalt.err (!%p3619_p8)
}
0x1f45   :  { %2867 = dma.vmem_to_hbm [thread:$0]  %s2865_s27, 64, %s4108_s5, [#allocation4]  }
0x1f46   :  { %3641 = dma.done.wait [#allocation4], 64  }
0x1f47   :  { %3642 = vsyncadd [#allocation4], 4294967232 }
0x1f48   :  { %2871 = vsyncpa [#allocation3], 1 }
0x1f49   :  { %2872 = vsyncpa [#allocation6], 1 }
0x1f4a   :  { %2873 = vsyncpa [#allocation9], 1 }
0x1f4b   :  { %2874 = vsyncpa [#allocation4], 1 }

</bundles_post_ra>
